<compile_context>
chip_gen: v6e
topology: v6e:2x2x1
jax: 0.10.0
libtpu: 0.0.40
codegen_flags: <defaults>
</compile_context>

<pallas_src>
import functools

import jax
import jax.numpy as jnp
from jax import lax
from jax.experimental import pallas as pl
from jax.experimental.pallas import tpu as pltpu

LN_EPS = 1e-5
_LANE = 128
_SUBLANE = 8


def _round_up(x, m):
    return (x + m - 1) // m * m


def _fct_block_kernel(x_ref, wf_ref, wm_ref, wl_ref, bgbh_ref, bgbl_ref, o_ref,
                      *, n_mid, hidden, h_pad, out_f, out_pad, last_act,
                      last_has_ln):
    """Fused FCTBlock forward for one row tile.

    x_ref   : (TM, in_pad)               zero-padded input rows (f32)
    wf_ref  : (in_pad, h_pad)             first-layer weight, bf16, zero-padded
    wm_ref  : (max(n_mid,1), h_pad, h_pad) hidden-layer weights, bf16
    wl_ref  : (h_pad, out_pad)            last-layer weight, bf16
    bgbh_ref: (n_mid+1, 3, h_pad)         rows = (bias, gamma, beta), f32
    bgbl_ref: (3, out_pad)                last layer (bias, gamma, beta), f32
    o_ref   : (TM, out_pad)               zero-padded output rows (f32)
    """

    def apply_layer(h, w, bgb, true_n, pad_n, act, has_ln):
        # bf16 inputs, f32 accumulate on the MXU.
        y = jnp.dot(h.astype(jnp.bfloat16), w,
                    preferred_element_type=jnp.float32) + bgb[0:1, :]
        if has_ln:
            gamma = bgb[1:2, :]
            beta = bgb[2:3, :]
            if true_n == pad_n:
                # Lane-dense layer: no mask needed.
                mean = jnp.mean(y, axis=-1, keepdims=True)
                meansq = jnp.mean(y * y, axis=-1, keepdims=True)
            else:
                lane = lax.broadcasted_iota(jnp.int32, (1, pad_n), 1)
                mask = (lane < true_n).astype(jnp.float32)
                inv_n = 1.0 / float(true_n)
                ym = y * mask
                mean = jnp.sum(ym, axis=-1, keepdims=True) * inv_n
                meansq = jnp.sum(ym * ym, axis=-1, keepdims=True) * inv_n
            var = jnp.maximum(meansq - mean * mean, 0.0)
            inv = lax.rsqrt(var + LN_EPS)
            # Padded lanes: gamma = beta = 0 -> exactly 0 afterwards.
            y = (y - mean) * inv * gamma + beta
        if act == "sigmoid":
            # Single EUP transcendental instead of exp + divide.
            y = 0.5 * jnp.tanh(0.5 * y) + 0.5
        elif act == "tanh":
            y = jnp.tanh(y)
        # No re-masking needed: padded weight ROWS of the next layer are zero,
        # so any nonzero padded-lane activation contributes nothing.
        return y

    h = x_ref[...].astype(jnp.float32)

    # First FCLayer: in_features -> hidden_ch (LayerNorm + Sigmoid).
    h = apply_layer(h, wf_ref[...], bgbh_ref[0], hidden, h_pad, "sigmoid", True)

    # Hidden FCLayers: hidden_ch -> hidden_ch (LayerNorm + Sigmoid).
    for l in range(n_mid):
        h = apply_layer(h, wm_ref[l], bgbh_ref[l + 1], hidden, h_pad,
                        "sigmoid", True)

    # Tail: Linear (+ LayerNorm + Tanh unless outermost_linear).
    h = apply_layer(h, wl_ref[...], bgbl_ref[...], out_f, out_pad,
                    last_act, last_has_ln)

    o_ref[...] = h.astype(o_ref.dtype)


def _vmem_limit_bytes(tm, in_pad, h_pad, out_pad, n_mid):
    io = 2 * tm * (in_pad + out_pad) * 4                       # double-buffered row tiles
    wts = (in_pad * h_pad + max(n_mid, 1) * h_pad * h_pad
           + h_pad * out_pad) * 2                              # bf16, single-buffered
    bgb = ((n_mid + 1) * 3 * h_pad + 3 * out_pad) * 4
    tmp = 4 * tm * max(in_pad, h_pad, out_pad) * 4             # live f32/bf16 temporaries
    need = io + wts + bgb + tmp + (4 << 20)                    # headroom
    try:
        cap = int(0.75 * pltpu.get_tpu_info().vmem_capacity_bytes)
    except Exception:  # pragma: no cover - conservative fallback
        cap = 48 << 20                                         # safe on every generation
    return int(min(max(need, 32 << 20), cap))


def _pack_params(params, in_pad, h_pad, out_pad):
    """Zero-pad and pack the layer stack; weights cast to bf16."""
    n_mid = len(params) - 2
    in_f = params[0]["w"].shape[0]
    hidden = params[0]["w"].shape[1]
    out_f = params[-1]["w"].shape[1]

    wf = jnp.zeros((in_pad, h_pad), jnp.float32).at[:in_f, :hidden].set(
        params[0]["w"])
    if n_mid > 0:
        wm = jnp.stack([
            jnp.zeros((h_pad, h_pad), jnp.float32)
            .at[:hidden, :hidden].set(params[1 + l]["w"])
            for l in range(n_mid)
        ])
    else:
        wm = jnp.zeros((1, h_pad, h_pad), jnp.float32)
    wl = jnp.zeros((h_pad, out_pad), jnp.float32).at[:hidden, :out_f].set(
        params[-1]["w"])

    def pack_bgb(p, pad):
        o = p["w"].shape[1]
        b = jnp.zeros((pad,), jnp.float32).at[:o].set(p["b"])
        if p["gamma"] is not None:
            g = jnp.zeros((pad,), jnp.float32).at[:o].set(p["gamma"])
            bt = jnp.zeros((pad,), jnp.float32).at[:o].set(p["beta"])
        else:
            g = jnp.zeros((pad,), jnp.float32)
            bt = jnp.zeros((pad,), jnp.float32)
        return jnp.stack([b, g, bt], axis=0)

    bgbh = jnp.stack([pack_bgb(p, h_pad) for p in params[:-1]], axis=0)
    bgbl = pack_bgb(params[-1], out_pad)

    return (wf.astype(jnp.bfloat16), wm.astype(jnp.bfloat16),
            wl.astype(jnp.bfloat16), bgbh, bgbl)


def fctblock_forward(params, x, *, tm=512):
    """x: (..., in_features) -> (..., out_features), fully fused."""
    lead = x.shape[:-1]
    in_f = x.shape[-1]
    hidden = params[0]["w"].shape[1]
    out_f = params[-1]["w"].shape[1]
    n_mid = len(params) - 2

    in_pad = _round_up(in_f, _LANE)
    h_pad = _round_up(hidden, _LANE)
    out_pad = _round_up(out_f, _LANE)

    h = x.reshape(-1, in_f).astype(jnp.float32)
    n = h.shape[0]

    # Large row tiles, clamped so any N works; force >= 2 grid steps when
    # there are enough rows so v7x's two TensorCores both get work.
    tm_eff = min(_round_up(tm, _SUBLANE), _round_up(n, _SUBLANE))
    if n > _SUBLANE and _round_up(n, tm_eff) // tm_eff < 2:
        tm_eff = _round_up((n + 1) // 2, _SUBLANE)
    n_pad = _round_up(n, tm_eff)

    xp = jnp.zeros((n_pad, in_pad), jnp.float32).at[:n, :in_f].set(h)
    wf, wm, wl, bgbh, bgbl = _pack_params(params, in_pad, h_pad, out_pad)

    last_act = params[-1]["activation"]
    last_has_ln = params[-1]["gamma"] is not None

    kernel = functools.partial(
        _fct_block_kernel, n_mid=n_mid, hidden=hidden, h_pad=h_pad,
        out_f=out_f, out_pad=out_pad, last_act=last_act,
        last_has_ln=last_has_ln)

    flops = 2 * n_pad * (in_pad * h_pad + n_mid * h_pad * h_pad
                         + h_pad * out_pad)
    transc = n_pad * ((n_mid + 1) * h_pad + out_pad)
    bytes_acc = (n_pad * (in_pad + out_pad) * 4
                 + int(wf.size + wm.size + wl.size) * 2
                 + int(bgbh.size + bgbl.size) * 4)
    cost = pl.CostEstimate(flops=int(flops), transcendentals=int(transc),
                           bytes_accessed=int(bytes_acc))

    def build(single_buffer_weights):
        if single_buffer_weights:
            # Grid-invariant operands resident once in VMEM (no double buffer).
            wspec = pl.BlockSpec(memory_space=pltpu.MemorySpace.VMEM)
            w_specs = [wspec, wspec, wspec, wspec, wspec]
        else:
            # Fallback: blocked, constant index_map (double-buffered).
            w_specs = [
                pl.BlockSpec((in_pad, h_pad), lambda i: (0, 0)),
                pl.BlockSpec((max(n_mid, 1), h_pad, h_pad),
                             lambda i: (0, 0, 0)),
                pl.BlockSpec((h_pad, out_pad), lambda i: (0, 0)),
                pl.BlockSpec((n_mid + 1, 3, h_pad), lambda i: (0, 0, 0)),
                pl.BlockSpec((3, out_pad), lambda i: (0, 0)),
            ]
        return pl.pallas_call(
            kernel,
            out_shape=jax.ShapeDtypeStruct((n_pad, out_pad), jnp.float32),
            grid_spec=pltpu.PrefetchScalarGridSpec(
                num_scalar_prefetch=0,
                grid=(n_pad // tm_eff,),
                in_specs=[pl.BlockSpec((tm_eff, in_pad), lambda i: (i, 0))]
                + w_specs,
                out_specs=pl.BlockSpec((tm_eff, out_pad), lambda i: (i, 0)),
            ),
            compiler_params=pltpu.CompilerParams(
                dimension_semantics=("parallel",),
                vmem_limit_bytes=_vmem_limit_bytes(tm_eff, in_pad, h_pad,
                                                   out_pad, n_mid),
            ),
            cost_estimate=cost,
        )

    try:
        out = build(single_buffer_weights=True)(xp, wf, wm, wl, bgbh, bgbl)
    except Exception:
        out = build(single_buffer_weights=False)(xp, wf, wm, wl, bgbh, bgbl)

    return out[:n, :out_f].reshape(*lead, out_f)


def init_fctblock_params(key, hidden_ch, num_hidden_layers, in_features,
                         out_features, outermost_linear=False):
    """Deterministic parameter init mirroring the module's layer shapes."""
    params = []
    dims = [(in_features, hidden_ch)]
    dims += [(hidden_ch, hidden_ch)] * num_hidden_layers

    def linear_init(k, fan_in, fan_out):
        # torch default: U(-1/sqrt(fan_in), 1/sqrt(fan_in))
        kw, kb = jax.random.split(k)
        bound = 1.0 / jnp.sqrt(fan_in)
        w = jax.random.uniform(kw, (fan_in, fan_out), jnp.float32, -bound, bound)
        b = jax.random.uniform(kb, (fan_out,), jnp.float32, -bound, bound)
        return w, b

    keys = jax.random.split(key, len(dims) + 1)
    for k, (fi, fo) in zip(keys[:-1], dims):
        w, b = linear_init(k, fi, fo)
        params.append(dict(w=w, b=b,
                           gamma=jnp.ones((fo,), jnp.float32),
                           beta=jnp.zeros((fo,), jnp.float32),
                           activation="sigmoid"))
    w, b = linear_init(keys[-1], hidden_ch, out_features)
    if outermost_linear:
        params.append(dict(w=w, b=b, gamma=None, beta=None, activation="none"))
    else:
        params.append(dict(w=w, b=b,
                           gamma=jnp.ones((out_features,), jnp.float32),
                           beta=jnp.zeros((out_features,), jnp.float32),
                           activation="tanh"))
    return params


def _reference_forward(params, x, matmul_dtype=jnp.float32):
    """Pure-JAX reference (PyTorch semantics; optional bf16-matmul variant)."""
    h = x.reshape(-1, x.shape[-1]).astype(jnp.float32)
    for p in params:
        y = jnp.dot(h.astype(matmul_dtype), p["w"].astype(matmul_dtype),
                    preferred_element_type=jnp.float32) + p["b"]
        if p["gamma"] is not None:
            mean = jnp.mean(y, axis=-1, keepdims=True)
            var = jnp.mean((y - mean) ** 2, axis=-1, keepdims=True)
            y = (y - mean) / jnp.sqrt(var + LN_EPS) * p["gamma"] + p["beta"]
        if p["activation"] == "sigmoid":
            y = jax.nn.sigmoid(y)
        elif p["activation"] == "tanh":
            y = jnp.tanh(y)
        h = y
    return h.reshape(*x.shape[:-1], h.shape[-1])


if __name__ == "__main__":
    key = jax.random.PRNGKey(0)
    kx, kp1, kp2 = jax.random.split(key, 3)

    # Small shapes consistent with the module: batch=2, seq=8, in=16,
    # hidden=32, out=16, 2 hidden layers.
    B, S, in_features = 2, 8, 16
    hidden_ch, num_hidden_layers, out_features = 32, 2, 16

    x = jax.random.normal(kx, (B, S, in_features), jnp.float32)

    # outermost_linear=False (FCTLayer tail: LayerNorm + Tanh)
    params = init_fctblock_params(kp1, hidden_ch, num_hidden_layers,
                                  in_features, out_features,
                                  outermost_linear=False)
    out = jax.block_until_ready(fctblock_forward(params, x))
    ref_bf16 = _reference_forward(params, x, matmul_dtype=jnp.bfloat16)
    ref_f32 = _reference_forward(params, x)
    assert out.shape == (B, S, out_features)
    assert jnp.allclose(out, ref_bf16, atol=1e-3, rtol=1e-3), \
        float(jnp.max(jnp.abs(out - ref_bf16)))
    assert jnp.allclose(out, ref_f32, atol=5e-2, rtol=5e-2), \
        float(jnp.max(jnp.abs(out - ref_f32)))

    # outermost_linear=True (plain Linear tail)
    params_lin = init_fctblock_params(kp2, hidden_ch, num_hidden_layers,
                                      in_features, out_features,
                                      outermost_linear=True)
    out_lin = jax.block_until_ready(fctblock_forward(params_lin, x))
    ref_lin_bf16 = _reference_forward(params_lin, x, matmul_dtype=jnp.bfloat16)
    ref_lin_f32 = _reference_forward(params_lin, x)
    assert out_lin.shape == (B, S, out_features)
    assert jnp.allclose(out_lin, ref_lin_bf16, atol=1e-3, rtol=1e-3), \
        float(jnp.max(jnp.abs(out_lin - ref_lin_bf16)))
    assert jnp.allclose(out_lin, ref_lin_f32, atol=5e-2, rtol=5e-2), \
        float(jnp.max(jnp.abs(out_lin - ref_lin_f32)))

    print("KERNEL_OK")
</pallas_src>

<mosaic_0001>
module attributes {stable_mosaic.version = 11 : i64} {
  func.func @_fct_block_kernel(%arg0: i32, %arg1: memref<8x128xf32, #tpu.memory_space<vmem>>, %arg2: memref<128x128xbf16, #tpu.memory_space<vmem>>, %arg3: memref<2x128x128xbf16, #tpu.memory_space<vmem>>, %arg4: memref<128x128xbf16, #tpu.memory_space<vmem>>, %arg5: memref<3x3x128xf32, #tpu.memory_space<vmem>>, %arg6: memref<3x128xf32, #tpu.memory_space<vmem>>, %arg7: memref<8x128xf32, #tpu.memory_space<vmem>>) attributes {dimension_semantics = [#tpu.dimension_semantics<parallel>], iteration_bounds = array<i64: 2>, scalar_prefetch = 0 : i64, scratch_operands = 0 : i64, tpu.core_type = #tpu.core_type<tc>, window_params = [{transform_indices = @transform_0, window_bounds = array<i64: 8, 128>}, {pipeline_mode = #tpu.pipeline_mode<synchronous>, transform_indices = @transform_1, window_bounds = array<i64: 128, 128>}, {pipeline_mode = #tpu.pipeline_mode<synchronous>, transform_indices = @transform_2, window_bounds = array<i64: 2, 128, 128>}, {pipeline_mode = #tpu.pipeline_mode<synchronous>, transform_indices = @transform_3, window_bounds = array<i64: 128, 128>}, {pipeline_mode = #tpu.pipeline_mode<synchronous>, transform_indices = @transform_4, window_bounds = array<i64: 3, 3, 128>}, {pipeline_mode = #tpu.pipeline_mode<synchronous>, transform_indices = @transform_5, window_bounds = array<i64: 3, 128>}, {transform_indices = @transform_6, window_bounds = array<i64: 8, 128>}]} {
    %c0 = arith.constant 0 : index
    %c0_0 = arith.constant 0 : index
    %0 = vector.load %arg1[%c0, %c0_0] : memref<8x128xf32, #tpu.memory_space<vmem>>, vector<8x128xf32>
    %c0_1 = arith.constant 0 : index
    %c0_2 = arith.constant 0 : index
    %1 = vector.load %arg2[%c0_1, %c0_2] : memref<128x128xbf16, #tpu.memory_space<vmem>>, vector<128x128xbf16>
    %c0_3 = arith.constant 0 : index
    %c0_4 = arith.constant 0 : index
    %c0_5 = arith.constant 0 : index
    %2 = vector.load %arg5[%c0_3, %c0_4, %c0_5] : memref<3x3x128xf32, #tpu.memory_space<vmem>>, vector<1x3x128xf32>
    %3 = vector.shape_cast %2 : vector<1x3x128xf32> to vector<3x128xf32>
    %4 = arith.truncf %0 : vector<8x128xf32> to vector<8x128xbf16>
    %cst = arith.constant dense<0.000000e+00> : vector<8x128xf32>
    %5 = tpu.matmul %4, %1, %cst {dimension_numbers = #tpu.dot_dimension_numbers<[1], [0], [0], [1], [0, 0, 1, 1], [], []>} : vector<8x128xbf16>, vector<128x128xbf16>, vector<8x128xf32> -> vector<8x128xf32>
    %6 = vector.extract_strided_slice %3 {offsets = [0, 0], sizes = [1, 128], strides = [1, 1]} : vector<3x128xf32> to vector<1x128xf32>
    %7 = vector.broadcast %6 : vector<1x128xf32> to vector<8x128xf32>
    %8 = arith.addf %5, %7 : vector<8x128xf32>
    %9 = vector.extract_strided_slice %3 {offsets = [1, 0], sizes = [1, 128], strides = [1, 1]} : vector<3x128xf32> to vector<1x128xf32>
    %10 = vector.extract_strided_slice %3 {offsets = [2, 0], sizes = [1, 128], strides = [1, 1]} : vector<3x128xf32> to vector<1x128xf32>
    %11 = tpu.iota {dimensions = array<i32: 1>} : vector<1x128xi32>
    %c32_i32 = arith.constant 32 : i32
    %12 = vector.broadcast %c32_i32 : i32 to vector<1x128xi32>
    %13 = arith.cmpi slt, %11, %12 : vector<1x128xi32>
    %14 = arith.extui %13 : vector<1x128xi1> to vector<1x128xi32>
    %15 = arith.sitofp %14 : vector<1x128xi32> to vector<1x128xf32>
    %16 = vector.broadcast %15 : vector<1x128xf32> to vector<8x128xf32>
    %17 = arith.mulf %8, %16 : vector<8x128xf32>
    %cst_6 = arith.constant dense<0.000000e+00> : vector<8xf32>
    %18 = vector.multi_reduction <add>, %17, %cst_6 [1] : vector<8x128xf32> to vector<8xf32>
    %19 = vector.shape_cast %18 : vector<8xf32> to vector<8x1xf32>
    %cst_7 = arith.constant 3.125000e-02 : f32
    %20 = vector.broadcast %cst_7 : f32 to vector<8x1xf32>
    %21 = arith.mulf %19, %20 : vector<8x1xf32>
    %22 = arith.mulf %17, %17 : vector<8x128xf32>
    %cst_8 = arith.constant dense<0.000000e+00> : vector<8xf32>
    %23 = vector.multi_reduction <add>, %22, %cst_8 [1] : vector<8x128xf32> to vector<8xf32>
    %24 = vector.shape_cast %23 : vector<8xf32> to vector<8x1xf32>
    %cst_9 = arith.constant 3.125000e-02 : f32
    %25 = vector.broadcast %cst_9 : f32 to vector<8x1xf32>
    %26 = arith.mulf %24, %25 : vector<8x1xf32>
    %27 = arith.mulf %21, %21 : vector<8x1xf32>
    %28 = arith.subf %26, %27 : vector<8x1xf32>
    %cst_10 = arith.constant 0.000000e+00 : f32
    %29 = vector.broadcast %cst_10 : f32 to vector<8x1xf32>
    %30 = arith.maximumf %28, %29 : vector<8x1xf32>
    %cst_11 = arith.constant 9.99999974E-6 : f32
    %31 = vector.broadcast %cst_11 : f32 to vector<8x1xf32>
    %32 = arith.addf %30, %31 : vector<8x1xf32>
    %33 = math.rsqrt %32 : vector<8x1xf32>
    %34 = vector.broadcast %21 : vector<8x1xf32> to vector<8x128xf32>
    %35 = arith.subf %8, %34 : vector<8x128xf32>
    %36 = vector.broadcast %33 : vector<8x1xf32> to vector<8x128xf32>
    %37 = arith.mulf %35, %36 : vector<8x128xf32>
    %38 = vector.broadcast %9 : vector<1x128xf32> to vector<8x128xf32>
    %39 = arith.mulf %37, %38 : vector<8x128xf32>
    %40 = vector.broadcast %10 : vector<1x128xf32> to vector<8x128xf32>
    %41 = arith.addf %39, %40 : vector<8x128xf32>
    %cst_12 = arith.constant 5.000000e-01 : f32
    %42 = vector.broadcast %cst_12 : f32 to vector<8x128xf32>
    %43 = arith.mulf %42, %41 : vector<8x128xf32>
    %44 = math.tanh %43 : vector<8x128xf32>
    %cst_13 = arith.constant 5.000000e-01 : f32
    %45 = vector.broadcast %cst_13 : f32 to vector<8x128xf32>
    %46 = arith.mulf %45, %44 : vector<8x128xf32>
    %cst_14 = arith.constant 5.000000e-01 : f32
    %47 = vector.broadcast %cst_14 : f32 to vector<8x128xf32>
    %48 = arith.addf %46, %47 : vector<8x128xf32>
    %c0_15 = arith.constant 0 : index
    %c0_16 = arith.constant 0 : index
    %c0_17 = arith.constant 0 : index
    %49 = vector.load %arg3[%c0_15, %c0_16, %c0_17] : memref<2x128x128xbf16, #tpu.memory_space<vmem>>, vector<1x128x128xbf16>
    %50 = vector.shape_cast %49 : vector<1x128x128xbf16> to vector<128x128xbf16>
    %c1 = arith.constant 1 : index
    %c0_18 = arith.constant 0 : index
    %c0_19 = arith.constant 0 : index
    %51 = vector.load %arg5[%c1, %c0_18, %c0_19] : memref<3x3x128xf32, #tpu.memory_space<vmem>>, vector<1x3x128xf32>
    %52 = vector.shape_cast %51 : vector<1x3x128xf32> to vector<3x128xf32>
    %53 = arith.truncf %48 : vector<8x128xf32> to vector<8x128xbf16>
    %cst_20 = arith.constant dense<0.000000e+00> : vector<8x128xf32>
    %54 = tpu.matmul %53, %50, %cst_20 {dimension_numbers = #tpu.dot_dimension_numbers<[1], [0], [0], [1], [0, 0, 1, 1], [], []>} : vector<8x128xbf16>, vector<128x128xbf16>, vector<8x128xf32> -> vector<8x128xf32>
    %55 = vector.extract_strided_slice %52 {offsets = [0, 0], sizes = [1, 128], strides = [1, 1]} : vector<3x128xf32> to vector<1x128xf32>
    %56 = vector.broadcast %55 : vector<1x128xf32> to vector<8x128xf32>
    %57 = arith.addf %54, %56 : vector<8x128xf32>
    %58 = vector.extract_strided_slice %52 {offsets = [1, 0], sizes = [1, 128], strides = [1, 1]} : vector<3x128xf32> to vector<1x128xf32>
    %59 = vector.extract_strided_slice %52 {offsets = [2, 0], sizes = [1, 128], strides = [1, 1]} : vector<3x128xf32> to vector<1x128xf32>
    %60 = tpu.iota {dimensions = array<i32: 1>} : vector<1x128xi32>
    %c32_i32_21 = arith.constant 32 : i32
    %61 = vector.broadcast %c32_i32_21 : i32 to vector<1x128xi32>
    %62 = arith.cmpi slt, %60, %61 : vector<1x128xi32>
    %63 = arith.extui %62 : vector<1x128xi1> to vector<1x128xi32>
    %64 = arith.sitofp %63 : vector<1x128xi32> to vector<1x128xf32>
    %65 = vector.broadcast %64 : vector<1x128xf32> to vector<8x128xf32>
    %66 = arith.mulf %57, %65 : vector<8x128xf32>
    %cst_22 = arith.constant dense<0.000000e+00> : vector<8xf32>
    %67 = vector.multi_reduction <add>, %66, %cst_22 [1] : vector<8x128xf32> to vector<8xf32>
    %68 = vector.shape_cast %67 : vector<8xf32> to vector<8x1xf32>
    %cst_23 = arith.constant 3.125000e-02 : f32
    %69 = vector.broadcast %cst_23 : f32 to vector<8x1xf32>
    %70 = arith.mulf %68, %69 : vector<8x1xf32>
    %71 = arith.mulf %66, %66 : vector<8x128xf32>
    %cst_24 = arith.constant dense<0.000000e+00> : vector<8xf32>
    %72 = vector.multi_reduction <add>, %71, %cst_24 [1] : vector<8x128xf32> to vector<8xf32>
    %73 = vector.shape_cast %72 : vector<8xf32> to vector<8x1xf32>
    %cst_25 = arith.constant 3.125000e-02 : f32
    %74 = vector.broadcast %cst_25 : f32 to vector<8x1xf32>
    %75 = arith.mulf %73, %74 : vector<8x1xf32>
    %76 = arith.mulf %70, %70 : vector<8x1xf32>
    %77 = arith.subf %75, %76 : vector<8x1xf32>
    %cst_26 = arith.constant 0.000000e+00 : f32
    %78 = vector.broadcast %cst_26 : f32 to vector<8x1xf32>
    %79 = arith.maximumf %77, %78 : vector<8x1xf32>
    %cst_27 = arith.constant 9.99999974E-6 : f32
    %80 = vector.broadcast %cst_27 : f32 to vector<8x1xf32>
    %81 = arith.addf %79, %80 : vector<8x1xf32>
    %82 = math.rsqrt %81 : vector<8x1xf32>
    %83 = vector.broadcast %70 : vector<8x1xf32> to vector<8x128xf32>
    %84 = arith.subf %57, %83 : vector<8x128xf32>
    %85 = vector.broadcast %82 : vector<8x1xf32> to vector<8x128xf32>
    %86 = arith.mulf %84, %85 : vector<8x128xf32>
    %87 = vector.broadcast %58 : vector<1x128xf32> to vector<8x128xf32>
    %88 = arith.mulf %86, %87 : vector<8x128xf32>
    %89 = vector.broadcast %59 : vector<1x128xf32> to vector<8x128xf32>
    %90 = arith.addf %88, %89 : vector<8x128xf32>
    %cst_28 = arith.constant 5.000000e-01 : f32
    %91 = vector.broadcast %cst_28 : f32 to vector<8x128xf32>
    %92 = arith.mulf %91, %90 : vector<8x128xf32>
    %93 = math.tanh %92 : vector<8x128xf32>
    %cst_29 = arith.constant 5.000000e-01 : f32
    %94 = vector.broadcast %cst_29 : f32 to vector<8x128xf32>
    %95 = arith.mulf %94, %93 : vector<8x128xf32>
    %cst_30 = arith.constant 5.000000e-01 : f32
    %96 = vector.broadcast %cst_30 : f32 to vector<8x128xf32>
    %97 = arith.addf %95, %96 : vector<8x128xf32>
    %c1_31 = arith.constant 1 : index
    %c0_32 = arith.constant 0 : index
    %c0_33 = arith.constant 0 : index
    %98 = vector.load %arg3[%c1_31, %c0_32, %c0_33] : memref<2x128x128xbf16, #tpu.memory_space<vmem>>, vector<1x128x128xbf16>
    %99 = vector.shape_cast %98 : vector<1x128x128xbf16> to vector<128x128xbf16>
    %c2 = arith.constant 2 : index
    %c0_34 = arith.constant 0 : index
    %c0_35 = arith.constant 0 : index
    %100 = vector.load %arg5[%c2, %c0_34, %c0_35] : memref<3x3x128xf32, #tpu.memory_space<vmem>>, vector<1x3x128xf32>
    %101 = vector.shape_cast %100 : vector<1x3x128xf32> to vector<3x128xf32>
    %102 = arith.truncf %97 : vector<8x128xf32> to vector<8x128xbf16>
    %cst_36 = arith.constant dense<0.000000e+00> : vector<8x128xf32>
    %103 = tpu.matmul %102, %99, %cst_36 {dimension_numbers = #tpu.dot_dimension_numbers<[1], [0], [0], [1], [0, 0, 1, 1], [], []>} : vector<8x128xbf16>, vector<128x128xbf16>, vector<8x128xf32> -> vector<8x128xf32>
    %104 = vector.extract_strided_slice %101 {offsets = [0, 0], sizes = [1, 128], strides = [1, 1]} : vector<3x128xf32> to vector<1x128xf32>
    %105 = vector.broadcast %104 : vector<1x128xf32> to vector<8x128xf32>
    %106 = arith.addf %103, %105 : vector<8x128xf32>
    %107 = vector.extract_strided_slice %101 {offsets = [1, 0], sizes = [1, 128], strides = [1, 1]} : vector<3x128xf32> to vector<1x128xf32>
    %108 = vector.extract_strided_slice %101 {offsets = [2, 0], sizes = [1, 128], strides = [1, 1]} : vector<3x128xf32> to vector<1x128xf32>
    %109 = tpu.iota {dimensions = array<i32: 1>} : vector<1x128xi32>
    %c32_i32_37 = arith.constant 32 : i32
    %110 = vector.broadcast %c32_i32_37 : i32 to vector<1x128xi32>
    %111 = arith.cmpi slt, %109, %110 : vector<1x128xi32>
    %112 = arith.extui %111 : vector<1x128xi1> to vector<1x128xi32>
    %113 = arith.sitofp %112 : vector<1x128xi32> to vector<1x128xf32>
    %114 = vector.broadcast %113 : vector<1x128xf32> to vector<8x128xf32>
    %115 = arith.mulf %106, %114 : vector<8x128xf32>
    %cst_38 = arith.constant dense<0.000000e+00> : vector<8xf32>
    %116 = vector.multi_reduction <add>, %115, %cst_38 [1] : vector<8x128xf32> to vector<8xf32>
    %117 = vector.shape_cast %116 : vector<8xf32> to vector<8x1xf32>
    %cst_39 = arith.constant 3.125000e-02 : f32
    %118 = vector.broadcast %cst_39 : f32 to vector<8x1xf32>
    %119 = arith.mulf %117, %118 : vector<8x1xf32>
    %120 = arith.mulf %115, %115 : vector<8x128xf32>
    %cst_40 = arith.constant dense<0.000000e+00> : vector<8xf32>
    %121 = vector.multi_reduction <add>, %120, %cst_40 [1] : vector<8x128xf32> to vector<8xf32>
    %122 = vector.shape_cast %121 : vector<8xf32> to vector<8x1xf32>
    %cst_41 = arith.constant 3.125000e-02 : f32
    %123 = vector.broadcast %cst_41 : f32 to vector<8x1xf32>
    %124 = arith.mulf %122, %123 : vector<8x1xf32>
    %125 = arith.mulf %119, %119 : vector<8x1xf32>
    %126 = arith.subf %124, %125 : vector<8x1xf32>
    %cst_42 = arith.constant 0.000000e+00 : f32
    %127 = vector.broadcast %cst_42 : f32 to vector<8x1xf32>
    %128 = arith.maximumf %126, %127 : vector<8x1xf32>
    %cst_43 = arith.constant 9.99999974E-6 : f32
    %129 = vector.broadcast %cst_43 : f32 to vector<8x1xf32>
    %130 = arith.addf %128, %129 : vector<8x1xf32>
    %131 = math.rsqrt %130 : vector<8x1xf32>
    %132 = vector.broadcast %119 : vector<8x1xf32> to vector<8x128xf32>
    %133 = arith.subf %106, %132 : vector<8x128xf32>
    %134 = vector.broadcast %131 : vector<8x1xf32> to vector<8x128xf32>
    %135 = arith.mulf %133, %134 : vector<8x128xf32>
    %136 = vector.broadcast %107 : vector<1x128xf32> to vector<8x128xf32>
    %137 = arith.mulf %135, %136 : vector<8x128xf32>
    %138 = vector.broadcast %108 : vector<1x128xf32> to vector<8x128xf32>
    %139 = arith.addf %137, %138 : vector<8x128xf32>
    %cst_44 = arith.constant 5.000000e-01 : f32
    %140 = vector.broadcast %cst_44 : f32 to vector<8x128xf32>
    %141 = arith.mulf %140, %139 : vector<8x128xf32>
    %142 = math.tanh %141 : vector<8x128xf32>
    %cst_45 = arith.constant 5.000000e-01 : f32
    %143 = vector.broadcast %cst_45 : f32 to vector<8x128xf32>
    %144 = arith.mulf %143, %142 : vector<8x128xf32>
    %cst_46 = arith.constant 5.000000e-01 : f32
    %145 = vector.broadcast %cst_46 : f32 to vector<8x128xf32>
    %146 = arith.addf %144, %145 : vector<8x128xf32>
    %c0_47 = arith.constant 0 : index
    %c0_48 = arith.constant 0 : index
    %147 = vector.load %arg4[%c0_47, %c0_48] : memref<128x128xbf16, #tpu.memory_space<vmem>>, vector<128x128xbf16>
    %c0_49 = arith.constant 0 : index
    %c0_50 = arith.constant 0 : index
    %148 = vector.load %arg6[%c0_49, %c0_50] : memref<3x128xf32, #tpu.memory_space<vmem>>, vector<3x128xf32>
    %149 = arith.truncf %146 : vector<8x128xf32> to vector<8x128xbf16>
    %cst_51 = arith.constant dense<0.000000e+00> : vector<8x128xf32>
    %150 = tpu.matmul %149, %147, %cst_51 {dimension_numbers = #tpu.dot_dimension_numbers<[1], [0], [0], [1], [0, 0, 1, 1], [], []>} : vector<8x128xbf16>, vector<128x128xbf16>, vector<8x128xf32> -> vector<8x128xf32>
    %151 = vector.extract_strided_slice %148 {offsets = [0, 0], sizes = [1, 128], strides = [1, 1]} : vector<3x128xf32> to vector<1x128xf32>
    %152 = vector.broadcast %151 : vector<1x128xf32> to vector<8x128xf32>
    %153 = arith.addf %150, %152 : vector<8x128xf32>
    %154 = vector.extract_strided_slice %148 {offsets = [1, 0], sizes = [1, 128], strides = [1, 1]} : vector<3x128xf32> to vector<1x128xf32>
    %155 = vector.extract_strided_slice %148 {offsets = [2, 0], sizes = [1, 128], strides = [1, 1]} : vector<3x128xf32> to vector<1x128xf32>
    %156 = tpu.iota {dimensions = array<i32: 1>} : vector<1x128xi32>
    %c16_i32 = arith.constant 16 : i32
    %157 = vector.broadcast %c16_i32 : i32 to vector<1x128xi32>
    %158 = arith.cmpi slt, %156, %157 : vector<1x128xi32>
    %159 = arith.extui %158 : vector<1x128xi1> to vector<1x128xi32>
    %160 = arith.sitofp %159 : vector<1x128xi32> to vector<1x128xf32>
    %161 = vector.broadcast %160 : vector<1x128xf32> to vector<8x128xf32>
    %162 = arith.mulf %153, %161 : vector<8x128xf32>
    %cst_52 = arith.constant dense<0.000000e+00> : vector<8xf32>
    %163 = vector.multi_reduction <add>, %162, %cst_52 [1] : vector<8x128xf32> to vector<8xf32>
    %164 = vector.shape_cast %163 : vector<8xf32> to vector<8x1xf32>
    %cst_53 = arith.constant 6.250000e-02 : f32
    %165 = vector.broadcast %cst_53 : f32 to vector<8x1xf32>
    %166 = arith.mulf %164, %165 : vector<8x1xf32>
    %167 = arith.mulf %162, %162 : vector<8x128xf32>
    %cst_54 = arith.constant dense<0.000000e+00> : vector<8xf32>
    %168 = vector.multi_reduction <add>, %167, %cst_54 [1] : vector<8x128xf32> to vector<8xf32>
    %169 = vector.shape_cast %168 : vector<8xf32> to vector<8x1xf32>
    %cst_55 = arith.constant 6.250000e-02 : f32
    %170 = vector.broadcast %cst_55 : f32 to vector<8x1xf32>
    %171 = arith.mulf %169, %170 : vector<8x1xf32>
    %172 = arith.mulf %166, %166 : vector<8x1xf32>
    %173 = arith.subf %171, %172 : vector<8x1xf32>
    %cst_56 = arith.constant 0.000000e+00 : f32
    %174 = vector.broadcast %cst_56 : f32 to vector<8x1xf32>
    %175 = arith.maximumf %173, %174 : vector<8x1xf32>
    %cst_57 = arith.constant 9.99999974E-6 : f32
    %176 = vector.broadcast %cst_57 : f32 to vector<8x1xf32>
    %177 = arith.addf %175, %176 : vector<8x1xf32>
    %178 = math.rsqrt %177 : vector<8x1xf32>
    %179 = vector.broadcast %166 : vector<8x1xf32> to vector<8x128xf32>
    %180 = arith.subf %153, %179 : vector<8x128xf32>
    %181 = vector.broadcast %178 : vector<8x1xf32> to vector<8x128xf32>
    %182 = arith.mulf %180, %181 : vector<8x128xf32>
    %183 = vector.broadcast %154 : vector<1x128xf32> to vector<8x128xf32>
    %184 = arith.mulf %182, %183 : vector<8x128xf32>
    %185 = vector.broadcast %155 : vector<1x128xf32> to vector<8x128xf32>
    %186 = arith.addf %184, %185 : vector<8x128xf32>
    %187 = math.tanh %186 : vector<8x128xf32>
    %c0_58 = arith.constant 0 : index
    %c0_59 = arith.constant 0 : index
    %188 = vector.load %arg7[%c0_58, %c0_59] : memref<8x128xf32, #tpu.memory_space<vmem>>, vector<8x128xf32>
    tpu.vector_store %arg7[%c0_58, %c0_59], %187 {strides = array<i32>} : memref<8x128xf32, #tpu.memory_space<vmem>>, vector<8x128xf32>,
    return
  }
  func.func @transform_0(%arg0: i32) -> (i32, i32) {
    %c0_i32 = arith.constant 0 : i32
    %c0_i32_0 = arith.constant 0 : i32
    return %arg0, %c0_i32 : i32, i32
  }
  func.func @transform_1(%arg0: i32) -> (i32, i32) {
    %c0_i32 = arith.constant 0 : i32
    %c0_i32_0 = arith.constant 0 : i32
    %c0_i32_1 = arith.constant 0 : i32
    return %c0_i32, %c0_i32_0 : i32, i32
  }
  func.func @transform_2(%arg0: i32) -> (i32, i32, i32) {
    %c0_i32 = arith.constant 0 : i32
    %c0_i32_0 = arith.constant 0 : i32
    %c0_i32_1 = arith.constant 0 : i32
    %c0_i32_2 = arith.constant 0 : i32
    return %c0_i32, %c0_i32_0, %c0_i32_1 : i32, i32, i32
  }
  func.func @transform_3(%arg0: i32) -> (i32, i32) {
    %c0_i32 = arith.constant 0 : i32
    %c0_i32_0 = arith.constant 0 : i32
    %c0_i32_1 = arith.constant 0 : i32
    return %c0_i32, %c0_i32_0 : i32, i32
  }
  func.func @transform_4(%arg0: i32) -> (i32, i32, i32) {
    %c0_i32 = arith.constant 0 : i32
    %c0_i32_0 = arith.constant 0 : i32
    %c0_i32_1 = arith.constant 0 : i32
    %c0_i32_2 = arith.constant 0 : i32
    return %c0_i32, %c0_i32_0, %c0_i32_1 : i32, i32, i32
  }
  func.func @transform_5(%arg0: i32) -> (i32, i32) {
    %c0_i32 = arith.constant 0 : i32
    %c0_i32_0 = arith.constant 0 : i32
    %c0_i32_1 = arith.constant 0 : i32
    return %c0_i32, %c0_i32_0 : i32, i32
  }
  func.func @transform_6(%arg0: i32) -> (i32, i32) {
    %c0_i32 = arith.constant 0 : i32
    %c0_i32_0 = arith.constant 0 : i32
    return %arg0, %c0_i32 : i32, i32
  }
}

module attributes {stable_mosaic.version = 11 : i64} {
  func.func @_fct_block_kernel(%arg0: i32, %arg1: memref<8x128xf32, #tpu.memory_space<vmem>>, %arg2: memref<128x128xbf16, #tpu.memory_space<vmem>>, %arg3: memref<2x128x128xbf16, #tpu.memory_space<vmem>>, %arg4: memref<128x128xbf16, #tpu.memory_space<vmem>>, %arg5: memref<3x3x128xf32, #tpu.memory_space<vmem>>, %arg6: memref<3x128xf32, #tpu.memory_space<vmem>>, %arg7: memref<8x128xf32, #tpu.memory_space<vmem>>) attributes {dimension_semantics = [#tpu.dimension_semantics<parallel>], iteration_bounds = array<i64: 2>, scalar_prefetch = 0 : i64, scratch_operands = 0 : i64, tpu.core_type = #tpu.core_type<tc>, window_params = [{transform_indices = @transform_0, window_bounds = array<i64: 8, 128>}, {pipeline_mode = #tpu.pipeline_mode<synchronous>, transform_indices = @transform_1, window_bounds = array<i64: 128, 128>}, {pipeline_mode = #tpu.pipeline_mode<synchronous>, transform_indices = @transform_2, window_bounds = array<i64: 2, 128, 128>}, {pipeline_mode = #tpu.pipeline_mode<synchronous>, transform_indices = @transform_3, window_bounds = array<i64: 128, 128>}, {pipeline_mode = #tpu.pipeline_mode<synchronous>, transform_indices = @transform_4, window_bounds = array<i64: 3, 3, 128>}, {pipeline_mode = #tpu.pipeline_mode<synchronous>, transform_indices = @transform_5, window_bounds = array<i64: 3, 128>}, {transform_indices = @transform_6, window_bounds = array<i64: 8, 128>}]} {
    %c0 = arith.constant 0 : index
    %c0_0 = arith.constant 0 : index
    %0 = vector.load %arg1[%c0, %c0_0] : memref<8x128xf32, #tpu.memory_space<vmem>>, vector<8x128xf32>
    %c0_1 = arith.constant 0 : index
    %c0_2 = arith.constant 0 : index
    %1 = vector.load %arg2[%c0_1, %c0_2] : memref<128x128xbf16, #tpu.memory_space<vmem>>, vector<128x128xbf16>
    %c0_3 = arith.constant 0 : index
    %c0_4 = arith.constant 0 : index
    %c0_5 = arith.constant 0 : index
    %2 = vector.load %arg5[%c0_3, %c0_4, %c0_5] : memref<3x3x128xf32, #tpu.memory_space<vmem>>, vector<1x3x128xf32>
    %3 = vector.shape_cast %2 : vector<1x3x128xf32> to vector<3x128xf32>
    %4 = arith.truncf %0 : vector<8x128xf32> to vector<8x128xbf16>
    %cst = arith.constant dense<0.000000e+00> : vector<8x128xf32>
    %5 = tpu.matmul %4, %1, %cst {dimension_numbers = #tpu.dot_dimension_numbers<[1], [0], [0], [1], [0, 0, 1, 1], [], []>} : vector<8x128xbf16>, vector<128x128xbf16>, vector<8x128xf32> -> vector<8x128xf32>
    %6 = vector.extract_strided_slice %3 {offsets = [0, 0], sizes = [1, 128], strides = [1, 1]} : vector<3x128xf32> to vector<1x128xf32>
    %7 = vector.broadcast %6 : vector<1x128xf32> to vector<8x128xf32>
    %8 = arith.addf %5, %7 : vector<8x128xf32>
    %9 = vector.extract_strided_slice %3 {offsets = [1, 0], sizes = [1, 128], strides = [1, 1]} : vector<3x128xf32> to vector<1x128xf32>
    %10 = vector.extract_strided_slice %3 {offsets = [2, 0], sizes = [1, 128], strides = [1, 1]} : vector<3x128xf32> to vector<1x128xf32>
    %11 = tpu.iota {dimensions = array<i32: 1>} : vector<1x128xi32>
    %c32_i32 = arith.constant 32 : i32
    %12 = vector.broadcast %c32_i32 : i32 to vector<1x128xi32>
    %13 = arith.cmpi slt, %11, %12 : vector<1x128xi32>
    %14 = arith.extui %13 : vector<1x128xi1> to vector<1x128xi32>
    %15 = arith.sitofp %14 : vector<1x128xi32> to vector<1x128xf32>
    %16 = vector.broadcast %15 : vector<1x128xf32> to vector<8x128xf32>
    %17 = arith.mulf %8, %16 : vector<8x128xf32>
    %cst_6 = arith.constant dense<0.000000e+00> : vector<8xf32>
    %18 = vector.multi_reduction <add>, %17, %cst_6 [1] : vector<8x128xf32> to vector<8xf32>
    %19 = vector.shape_cast %18 : vector<8xf32> to vector<8x1xf32>
    %cst_7 = arith.constant 3.125000e-02 : f32
    %20 = vector.broadcast %cst_7 : f32 to vector<8x1xf32>
    %21 = arith.mulf %19, %20 : vector<8x1xf32>
    %22 = arith.mulf %17, %17 : vector<8x128xf32>
    %cst_8 = arith.constant dense<0.000000e+00> : vector<8xf32>
    %23 = vector.multi_reduction <add>, %22, %cst_8 [1] : vector<8x128xf32> to vector<8xf32>
    %24 = vector.shape_cast %23 : vector<8xf32> to vector<8x1xf32>
    %cst_9 = arith.constant 3.125000e-02 : f32
    %25 = vector.broadcast %cst_9 : f32 to vector<8x1xf32>
    %26 = arith.mulf %24, %25 : vector<8x1xf32>
    %27 = arith.mulf %21, %21 : vector<8x1xf32>
    %28 = arith.subf %26, %27 : vector<8x1xf32>
    %cst_10 = arith.constant 0.000000e+00 : f32
    %29 = vector.broadcast %cst_10 : f32 to vector<8x1xf32>
    %30 = arith.maximumf %28, %29 : vector<8x1xf32>
    %cst_11 = arith.constant 9.99999974E-6 : f32
    %31 = vector.broadcast %cst_11 : f32 to vector<8x1xf32>
    %32 = arith.addf %30, %31 : vector<8x1xf32>
    %33 = math.rsqrt %32 : vector<8x1xf32>
    %34 = vector.broadcast %21 : vector<8x1xf32> to vector<8x128xf32>
    %35 = arith.subf %8, %34 : vector<8x128xf32>
    %36 = vector.broadcast %33 : vector<8x1xf32> to vector<8x128xf32>
    %37 = arith.mulf %35, %36 : vector<8x128xf32>
    %38 = vector.broadcast %9 : vector<1x128xf32> to vector<8x128xf32>
    %39 = arith.mulf %37, %38 : vector<8x128xf32>
    %40 = vector.broadcast %10 : vector<1x128xf32> to vector<8x128xf32>
    %41 = arith.addf %39, %40 : vector<8x128xf32>
    %cst_12 = arith.constant 5.000000e-01 : f32
    %42 = vector.broadcast %cst_12 : f32 to vector<8x128xf32>
    %43 = arith.mulf %42, %41 : vector<8x128xf32>
    %44 = math.tanh %43 : vector<8x128xf32>
    %cst_13 = arith.constant 5.000000e-01 : f32
    %45 = vector.broadcast %cst_13 : f32 to vector<8x128xf32>
    %46 = arith.mulf %45, %44 : vector<8x128xf32>
    %cst_14 = arith.constant 5.000000e-01 : f32
    %47 = vector.broadcast %cst_14 : f32 to vector<8x128xf32>
    %48 = arith.addf %46, %47 : vector<8x128xf32>
    %c0_15 = arith.constant 0 : index
    %c0_16 = arith.constant 0 : index
    %c0_17 = arith.constant 0 : index
    %49 = vector.load %arg3[%c0_15, %c0_16, %c0_17] : memref<2x128x128xbf16, #tpu.memory_space<vmem>>, vector<1x128x128xbf16>
    %50 = vector.shape_cast %49 : vector<1x128x128xbf16> to vector<128x128xbf16>
    %c1 = arith.constant 1 : index
    %c0_18 = arith.constant 0 : index
    %c0_19 = arith.constant 0 : index
    %51 = vector.load %arg5[%c1, %c0_18, %c0_19] : memref<3x3x128xf32, #tpu.memory_space<vmem>>, vector<1x3x128xf32>
    %52 = vector.shape_cast %51 : vector<1x3x128xf32> to vector<3x128xf32>
    %53 = arith.truncf %48 : vector<8x128xf32> to vector<8x128xbf16>
    %cst_20 = arith.constant dense<0.000000e+00> : vector<8x128xf32>
    %54 = tpu.matmul %53, %50, %cst_20 {dimension_numbers = #tpu.dot_dimension_numbers<[1], [0], [0], [1], [0, 0, 1, 1], [], []>} : vector<8x128xbf16>, vector<128x128xbf16>, vector<8x128xf32> -> vector<8x128xf32>
    %55 = vector.extract_strided_slice %52 {offsets = [0, 0], sizes = [1, 128], strides = [1, 1]} : vector<3x128xf32> to vector<1x128xf32>
    %56 = vector.broadcast %55 : vector<1x128xf32> to vector<8x128xf32>
    %57 = arith.addf %54, %56 : vector<8x128xf32>
    %58 = vector.extract_strided_slice %52 {offsets = [1, 0], sizes = [1, 128], strides = [1, 1]} : vector<3x128xf32> to vector<1x128xf32>
    %59 = vector.extract_strided_slice %52 {offsets = [2, 0], sizes = [1, 128], strides = [1, 1]} : vector<3x128xf32> to vector<1x128xf32>
    %60 = tpu.iota {dimensions = array<i32: 1>} : vector<1x128xi32>
    %c32_i32_21 = arith.constant 32 : i32
    %61 = vector.broadcast %c32_i32_21 : i32 to vector<1x128xi32>
    %62 = arith.cmpi slt, %60, %61 : vector<1x128xi32>
    %63 = arith.extui %62 : vector<1x128xi1> to vector<1x128xi32>
    %64 = arith.sitofp %63 : vector<1x128xi32> to vector<1x128xf32>
    %65 = vector.broadcast %64 : vector<1x128xf32> to vector<8x128xf32>
    %66 = arith.mulf %57, %65 : vector<8x128xf32>
    %cst_22 = arith.constant dense<0.000000e+00> : vector<8xf32>
    %67 = vector.multi_reduction <add>, %66, %cst_22 [1] : vector<8x128xf32> to vector<8xf32>
    %68 = vector.shape_cast %67 : vector<8xf32> to vector<8x1xf32>
    %cst_23 = arith.constant 3.125000e-02 : f32
    %69 = vector.broadcast %cst_23 : f32 to vector<8x1xf32>
    %70 = arith.mulf %68, %69 : vector<8x1xf32>
    %71 = arith.mulf %66, %66 : vector<8x128xf32>
    %cst_24 = arith.constant dense<0.000000e+00> : vector<8xf32>
    %72 = vector.multi_reduction <add>, %71, %cst_24 [1] : vector<8x128xf32> to vector<8xf32>
    %73 = vector.shape_cast %72 : vector<8xf32> to vector<8x1xf32>
    %cst_25 = arith.constant 3.125000e-02 : f32
    %74 = vector.broadcast %cst_25 : f32 to vector<8x1xf32>
    %75 = arith.mulf %73, %74 : vector<8x1xf32>
    %76 = arith.mulf %70, %70 : vector<8x1xf32>
    %77 = arith.subf %75, %76 : vector<8x1xf32>
    %cst_26 = arith.constant 0.000000e+00 : f32
    %78 = vector.broadcast %cst_26 : f32 to vector<8x1xf32>
    %79 = arith.maximumf %77, %78 : vector<8x1xf32>
    %cst_27 = arith.constant 9.99999974E-6 : f32
    %80 = vector.broadcast %cst_27 : f32 to vector<8x1xf32>
    %81 = arith.addf %79, %80 : vector<8x1xf32>
    %82 = math.rsqrt %81 : vector<8x1xf32>
    %83 = vector.broadcast %70 : vector<8x1xf32> to vector<8x128xf32>
    %84 = arith.subf %57, %83 : vector<8x128xf32>
    %85 = vector.broadcast %82 : vector<8x1xf32> to vector<8x128xf32>
    %86 = arith.mulf %84, %85 : vector<8x128xf32>
    %87 = vector.broadcast %58 : vector<1x128xf32> to vector<8x128xf32>
    %88 = arith.mulf %86, %87 : vector<8x128xf32>
    %89 = vector.broadcast %59 : vector<1x128xf32> to vector<8x128xf32>
    %90 = arith.addf %88, %89 : vector<8x128xf32>
    %cst_28 = arith.constant 5.000000e-01 : f32
    %91 = vector.broadcast %cst_28 : f32 to vector<8x128xf32>
    %92 = arith.mulf %91, %90 : vector<8x128xf32>
    %93 = math.tanh %92 : vector<8x128xf32>
    %cst_29 = arith.constant 5.000000e-01 : f32
    %94 = vector.broadcast %cst_29 : f32 to vector<8x128xf32>
    %95 = arith.mulf %94, %93 : vector<8x128xf32>
    %cst_30 = arith.constant 5.000000e-01 : f32
    %96 = vector.broadcast %cst_30 : f32 to vector<8x128xf32>
    %97 = arith.addf %95, %96 : vector<8x128xf32>
    %c1_31 = arith.constant 1 : index
    %c0_32 = arith.constant 0 : index
    %c0_33 = arith.constant 0 : index
    %98 = vector.load %arg3[%c1_31, %c0_32, %c0_33] : memref<2x128x128xbf16, #tpu.memory_space<vmem>>, vector<1x128x128xbf16>
    %99 = vector.shape_cast %98 : vector<1x128x128xbf16> to vector<128x128xbf16>
    %c2 = arith.constant 2 : index
    %c0_34 = arith.constant 0 : index
    %c0_35 = arith.constant 0 : index
    %100 = vector.load %arg5[%c2, %c0_34, %c0_35] : memref<3x3x128xf32, #tpu.memory_space<vmem>>, vector<1x3x128xf32>
    %101 = vector.shape_cast %100 : vector<1x3x128xf32> to vector<3x128xf32>
    %102 = arith.truncf %97 : vector<8x128xf32> to vector<8x128xbf16>
    %cst_36 = arith.constant dense<0.000000e+00> : vector<8x128xf32>
    %103 = tpu.matmul %102, %99, %cst_36 {dimension_numbers = #tpu.dot_dimension_numbers<[1], [0], [0], [1], [0, 0, 1, 1], [], []>} : vector<8x128xbf16>, vector<128x128xbf16>, vector<8x128xf32> -> vector<8x128xf32>
    %104 = vector.extract_strided_slice %101 {offsets = [0, 0], sizes = [1, 128], strides = [1, 1]} : vector<3x128xf32> to vector<1x128xf32>
    %105 = vector.broadcast %104 : vector<1x128xf32> to vector<8x128xf32>
    %106 = arith.addf %103, %105 : vector<8x128xf32>
    %107 = vector.extract_strided_slice %101 {offsets = [1, 0], sizes = [1, 128], strides = [1, 1]} : vector<3x128xf32> to vector<1x128xf32>
    %108 = vector.extract_strided_slice %101 {offsets = [2, 0], sizes = [1, 128], strides = [1, 1]} : vector<3x128xf32> to vector<1x128xf32>
    %109 = tpu.iota {dimensions = array<i32: 1>} : vector<1x128xi32>
    %c32_i32_37 = arith.constant 32 : i32
    %110 = vector.broadcast %c32_i32_37 : i32 to vector<1x128xi32>
    %111 = arith.cmpi slt, %109, %110 : vector<1x128xi32>
    %112 = arith.extui %111 : vector<1x128xi1> to vector<1x128xi32>
    %113 = arith.sitofp %112 : vector<1x128xi32> to vector<1x128xf32>
    %114 = vector.broadcast %113 : vector<1x128xf32> to vector<8x128xf32>
    %115 = arith.mulf %106, %114 : vector<8x128xf32>
    %cst_38 = arith.constant dense<0.000000e+00> : vector<8xf32>
    %116 = vector.multi_reduction <add>, %115, %cst_38 [1] : vector<8x128xf32> to vector<8xf32>
    %117 = vector.shape_cast %116 : vector<8xf32> to vector<8x1xf32>
    %cst_39 = arith.constant 3.125000e-02 : f32
    %118 = vector.broadcast %cst_39 : f32 to vector<8x1xf32>
    %119 = arith.mulf %117, %118 : vector<8x1xf32>
    %120 = arith.mulf %115, %115 : vector<8x128xf32>
    %cst_40 = arith.constant dense<0.000000e+00> : vector<8xf32>
    %121 = vector.multi_reduction <add>, %120, %cst_40 [1] : vector<8x128xf32> to vector<8xf32>
    %122 = vector.shape_cast %121 : vector<8xf32> to vector<8x1xf32>
    %cst_41 = arith.constant 3.125000e-02 : f32
    %123 = vector.broadcast %cst_41 : f32 to vector<8x1xf32>
    %124 = arith.mulf %122, %123 : vector<8x1xf32>
    %125 = arith.mulf %119, %119 : vector<8x1xf32>
    %126 = arith.subf %124, %125 : vector<8x1xf32>
    %cst_42 = arith.constant 0.000000e+00 : f32
    %127 = vector.broadcast %cst_42 : f32 to vector<8x1xf32>
    %128 = arith.maximumf %126, %127 : vector<8x1xf32>
    %cst_43 = arith.constant 9.99999974E-6 : f32
    %129 = vector.broadcast %cst_43 : f32 to vector<8x1xf32>
    %130 = arith.addf %128, %129 : vector<8x1xf32>
    %131 = math.rsqrt %130 : vector<8x1xf32>
    %132 = vector.broadcast %119 : vector<8x1xf32> to vector<8x128xf32>
    %133 = arith.subf %106, %132 : vector<8x128xf32>
    %134 = vector.broadcast %131 : vector<8x1xf32> to vector<8x128xf32>
    %135 = arith.mulf %133, %134 : vector<8x128xf32>
    %136 = vector.broadcast %107 : vector<1x128xf32> to vector<8x128xf32>
    %137 = arith.mulf %135, %136 : vector<8x128xf32>
    %138 = vector.broadcast %108 : vector<1x128xf32> to vector<8x128xf32>
    %139 = arith.addf %137, %138 : vector<8x128xf32>
    %cst_44 = arith.constant 5.000000e-01 : f32
    %140 = vector.broadcast %cst_44 : f32 to vector<8x128xf32>
    %141 = arith.mulf %140, %139 : vector<8x128xf32>
    %142 = math.tanh %141 : vector<8x128xf32>
    %cst_45 = arith.constant 5.000000e-01 : f32
    %143 = vector.broadcast %cst_45 : f32 to vector<8x128xf32>
    %144 = arith.mulf %143, %142 : vector<8x128xf32>
    %cst_46 = arith.constant 5.000000e-01 : f32
    %145 = vector.broadcast %cst_46 : f32 to vector<8x128xf32>
    %146 = arith.addf %144, %145 : vector<8x128xf32>
    %c0_47 = arith.constant 0 : index
    %c0_48 = arith.constant 0 : index
    %147 = vector.load %arg4[%c0_47, %c0_48] : memref<128x128xbf16, #tpu.memory_space<vmem>>, vector<128x128xbf16>
    %c0_49 = arith.constant 0 : index
    %c0_50 = arith.constant 0 : index
    %148 = vector.load %arg6[%c0_49, %c0_50] : memref<3x128xf32, #tpu.memory_space<vmem>>, vector<3x128xf32>
    %149 = arith.truncf %146 : vector<8x128xf32> to vector<8x128xbf16>
    %cst_51 = arith.constant dense<0.000000e+00> : vector<8x128xf32>
    %150 = tpu.matmul %149, %147, %cst_51 {dimension_numbers = #tpu.dot_dimension_numbers<[1], [0], [0], [1], [0, 0, 1, 1], [], []>} : vector<8x128xbf16>, vector<128x128xbf16>, vector<8x128xf32> -> vector<8x128xf32>
    %151 = vector.extract_strided_slice %148 {offsets = [0, 0], sizes = [1, 128], strides = [1, 1]} : vector<3x128xf32> to vector<1x128xf32>
    %152 = vector.broadcast %151 : vector<1x128xf32> to vector<8x128xf32>
    %153 = arith.addf %150, %152 : vector<8x128xf32>
    %154 = vector.extract_strided_slice %148 {offsets = [1, 0], sizes = [1, 128], strides = [1, 1]} : vector<3x128xf32> to vector<1x128xf32>
    %155 = vector.extract_strided_slice %148 {offsets = [2, 0], sizes = [1, 128], strides = [1, 1]} : vector<3x128xf32> to vector<1x128xf32>
    %156 = tpu.iota {dimensions = array<i32: 1>} : vector<1x128xi32>
    %c16_i32 = arith.constant 16 : i32
    %157 = vector.broadcast %c16_i32 : i32 to vector<1x128xi32>
    %158 = arith.cmpi slt, %156, %157 : vector<1x128xi32>
    %159 = arith.extui %158 : vector<1x128xi1> to vector<1x128xi32>
    %160 = arith.sitofp %159 : vector<1x128xi32> to vector<1x128xf32>
    %161 = vector.broadcast %160 : vector<1x128xf32> to vector<8x128xf32>
    %162 = arith.mulf %153, %161 : vector<8x128xf32>
    %cst_52 = arith.constant dense<0.000000e+00> : vector<8xf32>
    %163 = vector.multi_reduction <add>, %162, %cst_52 [1] : vector<8x128xf32> to vector<8xf32>
    %164 = vector.shape_cast %163 : vector<8xf32> to vector<8x1xf32>
    %cst_53 = arith.constant 6.250000e-02 : f32
    %165 = vector.broadcast %cst_53 : f32 to vector<8x1xf32>
    %166 = arith.mulf %164, %165 : vector<8x1xf32>
    %167 = arith.mulf %162, %162 : vector<8x128xf32>
    %cst_54 = arith.constant dense<0.000000e+00> : vector<8xf32>
    %168 = vector.multi_reduction <add>, %167, %cst_54 [1] : vector<8x128xf32> to vector<8xf32>
    %169 = vector.shape_cast %168 : vector<8xf32> to vector<8x1xf32>
    %cst_55 = arith.constant 6.250000e-02 : f32
    %170 = vector.broadcast %cst_55 : f32 to vector<8x1xf32>
    %171 = arith.mulf %169, %170 : vector<8x1xf32>
    %172 = arith.mulf %166, %166 : vector<8x1xf32>
    %173 = arith.subf %171, %172 : vector<8x1xf32>
    %cst_56 = arith.constant 0.000000e+00 : f32
    %174 = vector.broadcast %cst_56 : f32 to vector<8x1xf32>
    %175 = arith.maximumf %173, %174 : vector<8x1xf32>
    %cst_57 = arith.constant 9.99999974E-6 : f32
    %176 = vector.broadcast %cst_57 : f32 to vector<8x1xf32>
    %177 = arith.addf %175, %176 : vector<8x1xf32>
    %178 = math.rsqrt %177 : vector<8x1xf32>
    %179 = vector.broadcast %166 : vector<8x1xf32> to vector<8x128xf32>
    %180 = arith.subf %153, %179 : vector<8x128xf32>
    %181 = vector.broadcast %178 : vector<8x1xf32> to vector<8x128xf32>
    %182 = arith.mulf %180, %181 : vector<8x128xf32>
    %183 = vector.broadcast %154 : vector<1x128xf32> to vector<8x128xf32>
    %184 = arith.mulf %182, %183 : vector<8x128xf32>
    %185 = vector.broadcast %155 : vector<1x128xf32> to vector<8x128xf32>
    %186 = arith.addf %184, %185 : vector<8x128xf32>
    %187 = math.tanh %186 : vector<8x128xf32>
    %c0_58 = arith.constant 0 : index
    %c0_59 = arith.constant 0 : index
    %188 = vector.load %arg7[%c0_58, %c0_59] : memref<8x128xf32, #tpu.memory_space<vmem>>, vector<8x128xf32>
    tpu.vector_store %arg7[%c0_58, %c0_59], %187 {strides = array<i32>} : memref<8x128xf32, #tpu.memory_space<vmem>>, vector<8x128xf32>,
    return
  }
  func.func @transform_0(%arg0: i32) -> (i32, i32) {
    %c0_i32 = arith.constant 0 : i32
    %c0_i32_0 = arith.constant 0 : i32
    return %arg0, %c0_i32 : i32, i32
  }
  func.func @transform_1(%arg0: i32) -> (i32, i32) {
    %c0_i32 = arith.constant 0 : i32
    %c0_i32_0 = arith.constant 0 : i32
    %c0_i32_1 = arith.constant 0 : i32
    return %c0_i32, %c0_i32_0 : i32, i32
  }
  func.func @transform_2(%arg0: i32) -> (i32, i32, i32) {
    %c0_i32 = arith.constant 0 : i32
    %c0_i32_0 = arith.constant 0 : i32
    %c0_i32_1 = arith.constant 0 : i32
    %c0_i32_2 = arith.constant 0 : i32
    return %c0_i32, %c0_i32_0, %c0_i32_1 : i32, i32, i32
  }
  func.func @transform_3(%arg0: i32) -> (i32, i32) {
    %c0_i32 = arith.constant 0 : i32
    %c0_i32_0 = arith.constant 0 : i32
    %c0_i32_1 = arith.constant 0 : i32
    return %c0_i32, %c0_i32_0 : i32, i32
  }
  func.func @transform_4(%arg0: i32) -> (i32, i32, i32) {
    %c0_i32 = arith.constant 0 : i32
    %c0_i32_0 = arith.constant 0 : i32
    %c0_i32_1 = arith.constant 0 : i32
    %c0_i32_2 = arith.constant 0 : i32
    return %c0_i32, %c0_i32_0, %c0_i32_1 : i32, i32, i32
  }
  func.func @transform_5(%arg0: i32) -> (i32, i32) {
    %c0_i32 = arith.constant 0 : i32
    %c0_i32_0 = arith.constant 0 : i32
    %c0_i32_1 = arith.constant 0 : i32
    return %c0_i32, %c0_i32_0 : i32, i32
  }
  func.func @transform_6(%arg0: i32) -> (i32, i32) {
    %c0_i32 = arith.constant 0 : i32
    %c0_i32_0 = arith.constant 0 : i32
    return %arg0, %c0_i32 : i32, i32
  }
}

</mosaic_0001>

<bundles_post_ra>
// kernel: tpu_custom_call.1
= control target key start
LH: loop header
LB: loop body
LE: loop exit
PB: predicated region body
PF: predicated region fallthrough
CT: control target
= control target key end

     0   :  { %s1874_s0 = inlined_call_operand.hbm [shape: f32[16,128], index: 0, kind: input, shape index: {}]   ;;  %s1875_s1 = inlined_call_operand.hbm [shape: bf16[128,128], index: 1, kind: input, shape index: {}]   ;;  %s1876_s2 = inlined_call_operand.hbm [shape: bf16[2,128,128], index: 2, kind: input, shape index: {}]   ;;  %s1877_s3 = inlined_call_operand.hbm [shape: bf16[128,128], index: 3, kind: input, shape index: {}]   ;;  %s1878_s4 = inlined_call_operand.hbm [shape: f32[3,3,128], index: 4, kind: input, shape index: {}]   ;;  %s1879_s5 = inlined_call_operand.vmem [shape: f32[3,128], index: 5, kind: input, shape index: {}]   ;;  %s1880_s6 = inlined_call_operand.hbm [shape: f32[16,128], index: 6, kind: output, shape index: {}]  }
   0x1   :  { %1885 = sst [smem:[#allocation16_spill]] %s1875_s1 }
   0x2   :  { %11 = vsyncpa [#allocation3], 0 }
   0x3   :  { %13 = vsyncpa [#allocation3 + $0x1], 0 }
   0x4   :  { %14 = vsyncpa [#allocation6], 0 }
   0x5   :  { %15 = vsyncpa [#allocation9], 0 }
   0x6   :  { %16 = vsyncpa [#allocation4], 0 }
   0x7   :  { %18 = vsyncpa [#allocation4 + $0x1], 0  ;;  %s1574_s21 = smov 0   ;;  %s1576_s22 = smov 0  }
   0x8   :  { %s1578_s23 = smov 0   ;;  %s1580_s24 = smov 0  }
   0x9 LB: > { %s1529_s25 = smov [#allocation5]   ;;  %s1595_s27 = sadd.s32 4294967295, %s1527_s24   ;;  %s1527_s24 = sphi %s1580_s24, %s1906_s24   ;;  %s1523_s23 = sphi %s1578_s23, %s1905_s23   ;;  %s1519_s22 = sphi %s1576_s22, %s1904_s22   ;;  %s1515_s21 = sphi %s1574_s21, %s1903_s21  }
   0xa   : > { %s198_s26 = sshll.u32 %s1529_s25, 4  ;;  %p1015_p0 = scmp.ge.s32.totalorder %s1527_s24, 1  ;;  %s199_s26 = int_to_ptr.vmem [resolvable:$true] %s198_s26 }
   0xb   : > { %p1881_p1 = scmp.eq.s32.totalorder %s1595_s27, 0  ;;  %p186_p2 = scmp.lt.s32.totalorder %s1527_s24, 3 }
   0xc   : > { %s1530_s29 = smov [#allocation8]   ;;  %s1531_s8 = smov [#allocation7]  }
   0xd   : > { %p1600_p3 = pnand %p1015_p0, %p186_p2  ;;  %s224_s30 = sshll.u32 %s1530_s29, 4  ;;  %s1613_s30 = int_to_ptr.vmem [resolvable:$true] %s224_s30 }
   0xe   : > { %s211_s9 = sshll.u32 %s1531_s8, 4  ;;  %s1334_s10 = scalar_lea.vmem %s199_s26, 1024  ;;  %s1615_s9 = int_to_ptr.vmem [resolvable:$true] %s211_s9 }
   0xf   : > { %s1886_s28 = scalar_select %p1600_p3, 1, 0 }
  0x10   : > { %p1204_p5 = pneg %p1600_p3  ;;  %p1335_p8 = scmp.ne.s32.totalorder %s199_s26, %s1334_s10 }
  0x11   : > { %p1342_p11 = scmp.lt.s32.totalorder %s199_s26, %s199_s26  ;;  %p1343_p12 = scmp.lt.s32.totalorder %s1334_s10, %s1334_s10 }
  0x12   : > { %p1609_p6 = pnand %p1204_p5, %p1881_p1 }
  0x13   : > { %p1344_p13 = por %p1343_p12, %p1342_p11 }
  0x14   : > { %p1325_p7 = pneg %p1609_p6 }
  0x16   : > { %p1337_p9 = pnand %p1335_p8, %p1325_p7 }
  0x18   : > { %p1338_p10 = pneg %p1337_p9 }
  0x1a   : > { %p1345_p0 = pnand %p1344_p13, %p1338_p10 }
  0x1c   : > { %1348 = shalt.err (!%p1345_p0)
}
  0x1d   : > { %s1532_s11 = smov 64   ;;  %s1533_s12 = smov 4  }
  0x1e   : > { %s1888_s1 = sld [smem:[#allocation16_spill]]  ;;  %s1360_s15 = scalar_lea.vmem %s1613_s30, 1024 }
  0x1f   : > { %p1361_p2 = scmp.ne.s32.totalorder %s1613_s30, %s1360_s15  ;;  %p1368_p9 = scmp.lt.s32.totalorder %s1613_s30, %s1613_s30 }
  0x20   : > { %p1369_p10 = scmp.lt.s32.totalorder %s1360_s15, %s1360_s15 }
  0x21   : > { %p1363_p5 = pnand %p1361_p2, %p1325_p7 }
  0x22   : > { %p1370_p11 = por %p1369_p10, %p1368_p9 }
  0x23   : > { %p1364_p8 = pneg %p1363_p5 }
  0x24   : > { %1207 = dma.hbm_to_vmem [thread:$0]  (!%p1609_p6), %s1888_s1, 1024, %s199_s26, [#allocation6], %s1532_s11, %s1532_s11, %s1533_s12  }
  0x25   : > { %p1371_p12 = pnand %p1370_p11, %p1364_p8 }
  0x27   : > { %1374 = shalt.err (!%p1371_p12)
}
  0x28   : > { %1213 = dma.hbm_to_vmem [thread:$0]  (!%p1609_p6), %s1877_s3, 1024, %s1613_s30, [#allocation9], %s1532_s11, %s1532_s11, %s1533_s12  }
  0x29   : > { %s1386_s18 = scalar_lea.vmem %s1615_s9, 2048  ;;  %p1394_p5 = scmp.lt.s32.totalorder %s1615_s9, %s1615_s9 }
  0x2a   : > { %p1387_p13 = scmp.ne.s32.totalorder %s1615_s9, %s1386_s18  ;;  %p1395_p8 = scmp.lt.s32.totalorder %s1386_s18, %s1386_s18 }
  0x2c   : > { %p1389_p0 = pnand %p1387_p13, %p1325_p7  ;;  %p1396_p9 = por %p1395_p8, %p1394_p5 }
  0x2e   : > { %p1390_p2 = pneg %p1389_p0 }
  0x30   : > { %p1397_p10 = pnand %p1396_p9, %p1390_p2 }
  0x32   : > { %1400 = shalt.err (!%p1397_p10)
}
  0x33   : > { %1210 = dma.hbm_to_vmem [thread:$0]  (!%p1609_p6), %s1876_s2, 2048, %s1615_s9, [#allocation6], %s1532_s11, %s1532_s11, %s1533_s12  }
  0x34   : > { %s1534_s25 = smov [#allocation10]  }
  0x35   : > { %s237_s26 = sshll.u32 %s1534_s25, 4  ;;  %s238_s26 = int_to_ptr.vmem [resolvable:$true] %s237_s26 }
  0x36   : > { %s1412_s29 = scalar_lea.vmem %s238_s26, 192  ;;  %p1420_p0 = scmp.lt.s32.totalorder %s238_s26, %s238_s26 }
  0x37   : > { %p1413_p11 = scmp.ne.s32.totalorder %s238_s26, %s1412_s29  ;;  %p1421_p2 = scmp.lt.s32.totalorder %s1412_s29, %s1412_s29 }
  0x39   : > { %p1415_p12 = pnand %p1413_p11, %p1325_p7  ;;  %p1422_p5 = por %p1421_p2, %p1420_p0 }
  0x3b   : > { %p1416_p13 = pneg %p1415_p12 }
  0x3d   : > { %p1423_p8 = pnand %p1422_p5, %p1416_p13 }
  0x3f   : > { %1426 = shalt.err (!%p1423_p8)
}
  0x40   : > { %1216 = dma.hbm_to_vmem [thread:$0]  (!%p1609_p6), %s1878_s4, 192, %s238_s26, [#allocation9], %s1532_s11, %s1532_s11, %s1533_s12  }
  0x41   : > { %s1014_s7 = sadd.s32 4294967294, %s1527_s24   ;;  %s1675_s9 = sadd.s32 1, %s1527_s24  }
  0x42   : > { %s28_s10 = ssub.s32 %s1527_s24, %s1675_s9  ;;  %s31_s13 = sadd.s32 1, %s1523_s23 }
  0x43   : > { %p29_p7 = scmp.eq.s32.totalorder %s28_s10, 0  ;;  %p38_p9 = scmp.ne.s32.totalorder %s1523_s23, %s1519_s22 }
  0x44   : > { %p39_p10 = scmp.eq.s32.totalorder %s1527_s24, 0  ;;  %p44_p11 = scmp.ne.s32.totalorder %s1519_s22, %s1515_s21 }
  0x45   : > { %s1686_s14 = scalar_select %p29_p7, %s1523_s23, %s31_s13  }
  0x46   : > { %p1688_p12 = por %p39_p10, %p38_p9  ;;  %p1694_p6 = por %p1881_p1, %p44_p11 }
  0x47   : > { %p173_p13 = scmp.eq.s32.totalorder %s1595_s27, 1  ;;  %p179_p0 = scmp.eq.s32.totalorder %s1014_s7, 1 }
  0x48   : > { %s1890_s11 = scalar_select %p1694_p6, 1, 0 }
  0x49   : > { %p1229_p2 = scmp.lt.s32.totalorder %s1527_s24, 2  ;;  %s254_s12 = sand.u32 1, %s1523_s23  }
  0x4a   : > { %p1701_p5 = por %p173_p13, %p38_p9  ;;  %p1705_p8 = por %p179_p0, %p44_p11 }
  0x4b   : > { %s1021_s18 = sshll.u32 %s254_s12, 3  ;;  %s1022_s19 = sshll.u32 %s1527_s24, 7 }
  0x4c   : > { %s1891_s16 = scalar_select %p1701_p5, 1, 0 }
  0x4d   : > { %s1892_s17 = scalar_select %p1705_p8, 1, 0 }
  0x4e   : > { %s1713_s26 = scalar_lea.hbm %s1874_s0, %s1022_s19  ;;  %s258_s29 = scalar_lea.vmem [#allocation2], %s1021_s18 }
  0x4f   : > { %s265_s30 = sshll.u32 %s258_s29, 4  ;;  %p1717_p7 = pnand %p1229_p2, %p1688_p12  ;;  %s266_s30 = int_to_ptr.vmem [resolvable:$true] %s265_s30 }
  0x50   : > { %s255_s7 = scalar_lea.sflag [#allocation3], %s254_s12  ;;  %s1427_s10 = scalar_lea.hbm %s1713_s26, 128 }
  0x51   : > { %p1428_p9 = scmp.ne.s32.totalorder %s1713_s26, %s1427_s10  ;;  %p1429_p10 = pneg %p1717_p7 }
  0x52   : > { %s1432_s20 = scalar_lea.hbm %s1874_s0, 256  ;;  %p1433_p0 = scmp.lt.s32.totalorder %s1713_s26, %s1874_s0 }
  0x53   : > { %p1430_p11 = pnand %p1429_p10, %p1428_p9  ;;  %p1434_p12 = scmp.lt.s32.totalorder %s1432_s20, %s1427_s10 }
  0x55   : > { %p1431_p13 = pneg %p1430_p11  ;;  %p1435_p2 = por %p1434_p12, %p1433_p0 }
  0x57   : > { %p1436_p4 = pnand %p1435_p2, %p1431_p13 }
  0x59   : > { %1439 = shalt.err (!%p1436_p4)
}
  0x5a   : > { %s1440_s15 = scalar_lea.vmem %s266_s30, 128  ;;  %s1535_s12 = smov [#allocation2]  }
  0x5b   : > { %p1441_p1 = scmp.ne.s32.totalorder %s266_s30, %s1440_s15  ;;  %s1445_s29 = sshll.u32 %s1535_s12, 4  ;;  %s1446_s29 = int_to_ptr.vmem [resolvable:$false] %s1445_s29 }
  0x5c   : > { %s1447_s1 = scalar_lea.vmem %s1446_s29, 256  ;;  %p1448_p9 = scmp.lt.s32.totalorder %s266_s30, %s1446_s29 }
  0x5d   : > { %p1443_p8 = pnand %p1441_p1, %p1429_p10  ;;  %p1449_p11 = scmp.lt.s32.totalorder %s1447_s1, %s1440_s15 }
  0x5f   : > { %p1444_p5 = pneg %p1443_p8  ;;  %p1450_p6 = por %p1449_p11, %p1448_p9 }
  0x61   : > { %p1451_p3 = pnand %p1450_p6, %p1444_p5 }
  0x63   : > { %1454 = shalt.err (!%p1451_p3)
}
  0x64   : > { %1220 = dma.hbm_to_vmem [thread:$0]  (!%p1717_p7), %s1713_s26, 128, %s266_s30, %s255_s7  }
  0x65   : > { %p1894_p13 = scmp.ne.s32.totalorder %s1886_s28, 0 }
  0x66   : > { %s1738_s10 = sand.u32 (!%p1894_p13), 1, %s1519_s22   ;;  %p1895_p1 = scmp.ne.s32.totalorder (!%p1894_p13), %s1890_s11, 0 }
  0x67   : > { %274 = sbr.rel (%p1894_p13) target bundleno = 1706 (0x6aa), region = 44  ;;  %s1024_s13 = sshll.u32 (!%p1894_p13), %s1738_s10, 3 }
  0x68   : > { %s277_s19 = scalar_lea.sflag (!%p1894_p13), [#allocation3], %s1738_s10  ;;  %s1744_s1 = scalar_lea.vmem (!%p1894_p13), [#allocation2], %s1024_s13 }
  0x6c   : > { %1498 = dma.done.wait (%p1895_p1), %s277_s19, 128  }
  0x6d   : > { %1500 = vsyncadd (%p1895_p1), %s277_s19, 4294967168  ;;  %p1896_p3 = scmp.eq.s32.totalorder %s1595_s27, 0 }
  0x6f   : > { %1502 = dma.done.wait (%p1896_p3), [#allocation6], 3072   ;;  %p1897_p4 = pmov %p1896_p3 }
  0x70   : > { %p1898_p6 = pmov %p1896_p3 }
  0x71   : > { %1504 = vsyncadd (%p1897_p4), [#allocation6], 4294964224 }
  0x72   : > { %1506 = dma.done.wait (%p1898_p6), [#allocation9], 1216   ;;  %p1899_p5 = pmov %p1896_p3 }
  0x73   : > { %v1536_v0 = vmov 0.0   ;;  %vm1537_vm0 = vmmov 0   ;;  %v1275_v1 = vld [vmem:[#allocation5 + $0x38] sm:$0xff]   ;;  %v1276_v2 = vld [vmem:[#allocation5 + $0x30] sm:$0xff]   ;;  %v1277_v3 = vld [vmem:[#allocation5 + $0x28] sm:$0xff]   ;;  %v345_v11 = vlaneseq  ;;  %s1065_s26 = sshll.u32 %s1595_s27, 7 }
  0x74   : > { %1508 = vsyncadd (%p1899_p5), [#allocation9], 4294966080  ;;  %1104 = vmatprep.subr.bf16.mxu0 %v1536_v0  ;;  %1120 = vmatprep.mubr.msk.bf16.mxu0 %vm1537_vm0, %v1536_v0  ;;  %v1278_v4 = vld [vmem:[#allocation5 + $0x20] sm:$0xff]   ;;  %v1279_v5 = vld [vmem:[#allocation5 + $0x18] sm:$0xff]   ;;  %s324_s30 = scalar_lea.vmem [#allocation11], %s1024_s13  ;;  %s1837_s18 = scalar_lea.hbm %s1880_s6, %s1065_s26 }
  0x75   : > { %1124 = vmatprep.subr.bf16.mxu1 %v1536_v0  ;;  %1140 = vmatprep.mubr.msk.bf16.mxu1 %vm1537_vm0, %v1536_v0  ;;  %v1280_v6 = vld [vmem:[#allocation5 + $0x10] sm:$0xff]   ;;  %v1281_v7 = vld [vmem:[#allocation5 + $0x8] sm:$0xff]   ;;  %v1282_v8 = vld [vmem:[#allocation5] sm:$0xff]   ;;  %v346_v12 = vshrl.u32 %v345_v11, 7  ;;  %v1777_v14 = vand.u32 127, %v345_v11  ;;  %s906_s8 = sshll.u32 %s324_s30, 4  ;;  %s907_s8 = int_to_ptr.vmem [resolvable:$true] %s906_s8 }
  0x76   : > { %1105 = vmatpush3.bf16.msra.mxu0 %v1275_v1  ;;  %v326_v9 = vld [vmem:[%s1744_s1] sm:$0xff]  ;;  %v343_v15 = vld [vmem:[#allocation10] sm:$0x7]  ;;  %v1285_v27 = vld [vmem:[#allocation7 + $0x28] sm:$0xff]   ;;  %s893_s25 = scalar_lea.sflag [#allocation4], %s1738_s10  ;;  %s1455_s15 = scalar_lea.vmem %s907_s8, 128 }
  0x77   : > { %1106 = vmatprep.subr.bf16.mxu0 %v1536_v0  ;;  %v344_v10 = vpack.c.bf16 %v326_v9, %v326_v9  ;;  %v1775_v13 = vsub.s32 0, %v346_v12  ;;  %vm439_vm1 = vcmp.lt.s32.totalorder %v1777_v14, 32  ;;  %v1283_v25 = vld [vmem:[#allocation7 + $0x38] sm:$0xff]   ;;  %v1284_v26 = vld [vmem:[#allocation7 + $0x30] sm:$0xff]   ;;  %v1286_v28 = vld [vmem:[#allocation7 + $0x20] sm:$0xff]   ;;  %v1793_v41 = vsub.s32 1, %v346_v12  ;;  %p1456_p8 = scmp.ne.s32.totalorder %s907_s8, %s1455_s15 }
  0x78   : > { %v1782_v18 = vsel %vm439_vm1, 1.0, %v1536_v0  ;;  %1125 = vmatpush3.bf16.msra.mxu1 %v1283_v25  ;;  %v1287_v29 = vld [vmem:[#allocation7 + $0x18] sm:$0xff]   ;;  %v1288_v30 = vld [vmem:[#allocation7 + $0x10] sm:$0xff]   ;;  %v1289_v31 = vld [vmem:[#allocation7 + $0x8] sm:$0xff]   ;;  %v1795_v42 = vsub.s32 2, %v346_v12  ;;  %vm862_vm2 = vcmp.lt.s32.totalorder %v1777_v14, 16 }
  0x79   : > { %v348_v16 = vrot.slane %v343_v15, %v1775_v13  ;;  %1126 = vmatprep.subr.bf16.mxu1 %v1536_v0  ;;  %v1290_v32 = vld [vmem:[#allocation7] sm:$0xff]   ;;  %v460_v43 = vrot.slane %v343_v15, %v1793_v41  ;;  %v1291_v1 = vld [vmem:[#allocation7 + $0x78] sm:$0xff]   ;;  %p1900_p7 = scmp.ne.s32.totalorder %s1891_s16, 0  ;;  %s1538_s12 = smov [#allocation11]  }
  0x7a   : > { %1107 = vmatpush3.bf16.msra.mxu0 %v1276_v2  ;;  %v465_v46 = vrot.slane %v343_v15, %v1795_v42  ;;  %v488_v55 = vld [vmem:[#allocation10 + $0x4] sm:$0x7]  ;;  %v1292_v2 = vld [vmem:[#allocation7 + $0x70] sm:$0xff]   ;;  %s1459_s29 = sshll.u32 %s1538_s12, 4  ;;  %s1460_s29 = int_to_ptr.vmem [resolvable:$false] %s1459_s29 }
  0x7b   : > { %1108 = vmatprep.subr.bf16.mxu0 %v1536_v0  ;;  %v493_v56 = vrot.slane %v488_v55, %v1775_v13  ;;  %p1457_p10 = pnand %p1456_p8, %p1900_p7  ;;  %s1461_s27 = scalar_lea.vmem %s1460_s29, 256 }
  0x7c   : > { %1127 = vmatpush3.bf16.msra.mxu1 %v1284_v26  ;;  %p1462_p12 = scmp.lt.s32.totalorder %s907_s8, %s1460_s29  ;;  %p1463_p2 = scmp.lt.s32.totalorder %s1461_s27, %s1455_s15 }
  0x7d   : > { %1128 = vmatprep.subr.bf16.mxu1 %v1536_v0  ;;  %p1458_p0 = pneg %p1457_p10 }
  0x7e   : > { %1109 = vmatpush3.bf16.msra.mxu0 %v1277_v3  ;;  %v1293_v3 = vld [vmem:[#allocation7 + $0x68] sm:$0xff]   ;;  %p1464_p9 = por %p1463_p2, %p1462_p12 }
  0x7f   : > { %1110 = vmatprep.subr.bf16.mxu0 %v1536_v0 }
  0x80   : > { %1129 = vmatpush3.bf16.msra.mxu1 %v1285_v27  ;;  %p1465_p11 = pnand %p1464_p9, %p1458_p0 }
  0x81   : > { %1130 = vmatprep.subr.bf16.mxu1 %v1536_v0 }
  0x82   : > { %1111 = vmatpush3.bf16.msra.mxu0 %v1278_v4  ;;  %v1294_v4 = vld [vmem:[#allocation7 + $0x60] sm:$0xff]  }
  0x83   : > { %1112 = vmatprep.subr.bf16.mxu0 %v1536_v0 }
  0x84   : > { %1131 = vmatpush3.bf16.msra.mxu1 %v1286_v28 }
  0x85   : > { %1132 = vmatprep.subr.bf16.mxu1 %v1536_v0 }
  0x86   : > { %1113 = vmatpush3.bf16.msra.mxu0 %v1279_v5  ;;  %v1295_v5 = vld [vmem:[#allocation7 + $0x58] sm:$0xff]  }
  0x87   : > { %1114 = vmatprep.subr.bf16.mxu0 %v1536_v0 }
  0x88   : > { %1133 = vmatpush3.bf16.msra.mxu1 %v1287_v29 }
  0x89   : > { %1134 = vmatprep.subr.bf16.mxu1 %v1536_v0 }
  0x8a   : > { %1115 = vmatpush3.bf16.msra.mxu0 %v1280_v6  ;;  %v1296_v6 = vld [vmem:[#allocation7 + $0x50] sm:$0xff]  }
  0x8b   : > { %1116 = vmatprep.subr.bf16.mxu0 %v1536_v0 }
  0x8c   : > { %1135 = vmatpush3.bf16.msra.mxu1 %v1288_v30 }
  0x8d   : > { %1136 = vmatprep.subr.bf16.mxu1 %v1536_v0 }
  0x8e   : > { %1117 = vmatpush3.bf16.msra.mxu0 %v1281_v7  ;;  %v1297_v7 = vld [vmem:[#allocation7 + $0x48] sm:$0xff]  }
  0x8f   : > { %1118 = vmatprep.subr.bf16.mxu0 %v1536_v0 }
  0x90   : > { %1137 = vmatpush3.bf16.msra.mxu1 %v1289_v31 }
  0x91   : > { %1138 = vmatprep.subr.bf16.mxu1 %v1536_v0 }
  0x92   : > { %1119 = vmatpush3.bf16.msra.mxu0 %v1282_v8  ;;  %v1298_v8 = vld [vmem:[#allocation7 + $0x40] sm:$0xff]  }
  0x93   : > { %1144 = vmatprep.subr.bf16.mxu0 %v1536_v0 }
  0x94   : > { %1139 = vmatpush3.bf16.msra.mxu1 %v1290_v32  ;;  %v629_v32 = vld [vmem:[#allocation10 + $0x8] sm:$0x7] }
  0x95   : > { %1121 = vmatmul.mubr.bf16.vlgmr.msra.gmra.mxu0 %v344_v10  ;;  %1164 = vmatprep.subr.bf16.mxu1 %v1536_v0 }
  0x96   : > { %1160 = vmatprep.mubr.msk.bf16.mxu0 %vm1537_vm0, %v1536_v0  ;;  %1145 = vmatpush3.bf16.msra.mxu0 %v1291_v1 }
  0x97   : > { %1146 = vmatprep.subr.bf16.mxu0 %v1536_v0 }
  0x9a   : > { %1147 = vmatpush3.bf16.msra.mxu0 %v1292_v2 }
  0x9b   : > { %1148 = vmatprep.subr.bf16.mxu0 %v1536_v0 }
  0x9e   : > { %1149 = vmatpush3.bf16.msra.mxu0 %v1293_v3 }
  0x9f   : > { %1150 = vmatprep.subr.bf16.mxu0 %v1536_v0 }
  0xa2   : > { %1151 = vmatpush3.bf16.msra.mxu0 %v1294_v4 }
  0xa3   : > { %1152 = vmatprep.subr.bf16.mxu0 %v1536_v0 }
  0xa6   : > { %1153 = vmatpush3.bf16.msra.mxu0 %v1295_v5 }
  0xa7   : > { %1154 = vmatprep.subr.bf16.mxu0 %v1536_v0 }
  0xaa   : > { %1155 = vmatpush3.bf16.msra.mxu0 %v1296_v6 }
  0xab   : > { %1156 = vmatprep.subr.bf16.mxu0 %v1536_v0 }
  0xae   : > { %1157 = vmatpush3.bf16.msra.mxu0 %v1297_v7  ;;  %v768_v7 = vld [vmem:[%s1879_s5] sm:$0x7] }
  0xaf   : > { %1158 = vmatprep.subr.bf16.mxu0 %v1536_v0 }
  0xb2   : > { %1159 = vmatpush3.bf16.msra.mxu0 %v1298_v8  ;;  %v773_v8 = vrot.slane %v768_v7, %v1775_v13 }
 0x155   : > { %v431_v17 = vpop.f32.mrf.mxu0 }
 0x156   : > { %v432_v19 = vadd.f32 %v431_v17, %v348_v16 }
 0x157   : > { %v1122_v20 = vpop.f32.mrf.mxu0 }
 0x158   : > { %v442_v21 = vmul.f32 %v1782_v18, %v432_v19  ;;  %v600_v20 = vrot.slane %v488_v55, %v1793_v41 }
 0x159   : > { %v434_v22 = vpop.f32.mrf.mxu0 }
 0x15a   : > { %443 = vadd.xlane.f32.xlu0 %v442_v21  ;;  %v446_v24 = vmul.f32 %v442_v21, %v442_v21 }
 0x15b   : > { %v1123_v23 = vpop.f32.mrf.mxu0 }
 0x15c   : > { %v605_v23 = vrot.slane %v488_v55, %v1795_v42 }
 0x15e   : > { %447 = vadd.xlane.f32.xlu0 %v446_v24 }
 0x1e3   : > { %v444_v33 = vpop.xlane.xlu0 %443 }
 0x1e4   : > { %v445_v34 = vmul.f32 0.03125, %v444_v33  ;;  %v634_v33 = vrot.slane %v629_v32, %v1775_v13 }
 0x1e6   : > { %v450_v36 = vmul.f32 %v445_v34, %v445_v34  ;;  %v455_v44 = vsub.f32 %v432_v19, %v445_v34 }
 0x1e7   : > { %v448_v35 = vpop.xlane.xlu0 %447 }
 0x1e8   : > { %v449_v37 = vmul.f32 0.03125, %v448_v35 }
 0x1ea   : > { %v451_v38 = vsub.f32 %v449_v37, %v450_v36 }
 0x1ec   : > { %v452_v39 = vmax.f32 %v451_v38, 0.0 }
 0x1ee   : > { %v453_v40 = vadd.f32 1e-05, %v452_v39 }
 0x1f0   : > { %1307 = vrsqrt.f32 %v453_v40 }
 0x1fd   : > { %v1308_v45 = vpop.eup %1307 }
 0x1fe   : > { %v456_v47 = vmul.f32 %v1308_v45, %v455_v44  ;;  %v1300_v44 = vld [vmem:[#allocation8 + $0x30] sm:$0xff]   ;;  %v1301_v45 = vld [vmem:[#allocation8 + $0x28] sm:$0xff]  }
 0x200   : > { %v461_v48 = vmul.f32 %v460_v43, %v456_v47  ;;  %v1299_v43 = vld [vmem:[#allocation8 + $0x38] sm:$0xff]   ;;  %v1304_v47 = vld [vmem:[#allocation8 + $0x10] sm:$0xff]  }
 0x202   : > { %v466_v49 = vadd.f32 %v465_v46, %v461_v48  ;;  %v1302_v46 = vld [vmem:[#allocation8 + $0x20] sm:$0xff]   ;;  %v1305_v48 = vld [vmem:[#allocation8 + $0x8] sm:$0xff]  }
 0x204   : > { %v467_v50 = vmul.f32 0.5, %v466_v49  ;;  %v1306_v49 = vld [vmem:[#allocation8] sm:$0xff]  }
 0x206   : > { %1309 = vtanh.f32 %v467_v50 }
 0x213   : > { %v1310_v51 = vpop.eup %1309 }
 0x214   : > { %v469_v52 = vmul.f32 0.5, %v1310_v51 }
 0x216   : > { %v470_v53 = vadd.f32 0.5, %v469_v52 }
 0x218   : > { %v489_v54 = vpack.c.bf16 %v470_v53, %v470_v53 }
 0x21a   : > { %1141 = vmatmul.mubr.bf16.vlgmr.msra.gmra.mxu1 %v489_v54 }
 0x21b   : > { %1180 = vmatprep.mubr.msk.bf16.mxu1 %vm1537_vm0, %v1536_v0  ;;  %1165 = vmatpush3.bf16.msra.mxu1 %v1299_v43 }
 0x21c   : > { %1166 = vmatprep.subr.bf16.mxu1 %v1536_v0 }
 0x21f   : > { %1167 = vmatpush3.bf16.msra.mxu1 %v1300_v44 }
 0x220   : > { %1168 = vmatprep.subr.bf16.mxu1 %v1536_v0 }
 0x223   : > { %1169 = vmatpush3.bf16.msra.mxu1 %v1301_v45 }
 0x224   : > { %1170 = vmatprep.subr.bf16.mxu1 %v1536_v0 }
 0x227   : > { %1171 = vmatpush3.bf16.msra.mxu1 %v1302_v46 }
 0x228   : > { %1172 = vmatprep.subr.bf16.mxu1 %v1536_v0 }
 0x2da   : > { %v576_v57 = vpop.f32.mrf.mxu1 }
 0x2db   : > { %v577_v58 = vadd.f32 %v576_v57, %v493_v56 }
 0x2dc   : > { %v1142_v59 = vpop.f32.mrf.mxu1 }
 0x2dd   : > { %v582_v60 = vmul.f32 %v1782_v18, %v577_v58 }
 0x2de   : > { %v579_v61 = vpop.f32.mrf.mxu1 }
 0x2df   : > { %583 = vadd.xlane.f32.xlu1 %v582_v60  ;;  %v586_v63 = vmul.f32 %v582_v60, %v582_v60  ;;  %v746_v61 = vrot.slane %v629_v32, %v1795_v42 }
 0x2e0   : > { %v1143_v62 = vpop.f32.mrf.mxu1 }
 0x2e3   : > { %587 = vadd.xlane.f32.xlu1 %v586_v63 }
 0x368   : > { %v584_v9 = vpop.xlane.xlu1 %583 }
 0x369   : > { %v585_v10 = vmul.f32 0.03125, %v584_v9 }
 0x36b   : > { %v590_v12 = vmul.f32 %v585_v10, %v585_v10  ;;  %v595_v21 = vsub.f32 %v577_v58, %v585_v10  ;;  %v741_v58 = vrot.slane %v629_v32, %v1793_v41  ;;  %v1063_v10 = vsel %vm862_vm2, 1.0, %v1536_v0 }
 0x36c   : > { %v588_v11 = vpop.xlane.xlu1 %587 }
 0x36d   : > { %v589_v15 = vmul.f32 0.03125, %v588_v11 }
 0x36f   : > { %v591_v16 = vsub.f32 %v589_v15, %v590_v12 }
 0x371   : > { %v592_v17 = vmax.f32 %v591_v16, 0.0 }
 0x373   : > { %v593_v19 = vadd.f32 1e-05, %v592_v17 }
 0x375   : > { %1311 = vrsqrt.f32 %v593_v19 }
 0x382   : > { %v1312_v22 = vpop.eup %1311 }
 0x383   : > { %v596_v24 = vmul.f32 %v1312_v22, %v595_v21 }
 0x385   : > { %v601_v25 = vmul.f32 %v600_v20, %v596_v24 }
 0x387   : > { %v606_v26 = vadd.f32 %v605_v23, %v601_v25 }
 0x389   : > { %v607_v27 = vmul.f32 0.5, %v606_v26 }
 0x38b   : > { %1313 = vtanh.f32 %v607_v27 }
 0x398   : > { %v1314_v28 = vpop.eup %1313 }
 0x399   : > { %v609_v29 = vmul.f32 0.5, %v1314_v28  ;;  %v888_v28 = vrot.slane %v768_v7, %v1795_v42 }
 0x39b   : > { %v610_v30 = vadd.f32 0.5, %v609_v29 }
 0x39d   : > { %v630_v31 = vpack.c.bf16 %v610_v30, %v610_v30 }
 0x39f   : > { %1161 = vmatmul.mubr.bf16.vlgmr.msra.gmra.mxu0 %v630_v31 }
 0x45f   : > { %v717_v34 = vpop.f32.mrf.mxu0 }
 0x460   : > { %v718_v35 = vadd.f32 %v717_v34, %v634_v33 }
 0x461   : > { %v1162_v36 = vpop.f32.mrf.mxu0 }
 0x462   : > { %v723_v37 = vmul.f32 %v1782_v18, %v718_v35  ;;  %v1303_v18 = vld [vmem:[#allocation8 + $0x18] sm:$0xff]  }
 0x463   : > { %v720_v38 = vpop.f32.mrf.mxu0  ;;  %1173 = vmatpush3.bf16.msra.mxu1 %v1303_v18 }
 0x464   : > { %724 = vadd.xlane.f32.xlu0 %v723_v37  ;;  %v727_v39 = vmul.f32 %v723_v37, %v723_v37  ;;  %1174 = vmatprep.subr.bf16.mxu1 %v1536_v0 }
 0x465   : > { %v1163_v40 = vpop.f32.mrf.mxu0 }
 0x466   : > { %728 = vadd.xlane.f32.xlu1 %v727_v39 }
 0x467   : > { %1175 = vmatpush3.bf16.msra.mxu1 %v1304_v47 }
 0x468   : > { %1176 = vmatprep.subr.bf16.mxu1 %v1536_v0 }
 0x46b   : > { %1177 = vmatpush3.bf16.msra.mxu1 %v1305_v48 }
 0x46c   : > { %1178 = vmatprep.subr.bf16.mxu1 %v1536_v0  ;;  %v883_v0 = vrot.slane %v768_v7, %v1793_v41 }
 0x46f   : > { %1179 = vmatpush3.bf16.msra.mxu1 %v1306_v49 }
 0x4ed   : > { %v725_v50 = vpop.xlane.xlu0 %724 }
 0x4ee   : > { %v726_v51 = vmul.f32 0.03125, %v725_v50 }
 0x4ef   : > { %v729_v52 = vpop.xlane.xlu1 %728 }
 0x4f0   : > { %v731_v53 = vmul.f32 %v726_v51, %v726_v51  ;;  %v730_v54 = vmul.f32 0.03125, %v729_v52  ;;  %v736_v59 = vsub.f32 %v718_v35, %v726_v51 }
 0x4f2   : > { %v732_v55 = vsub.f32 %v730_v54, %v731_v53 }
 0x4f4   : > { %v733_v56 = vmax.f32 %v732_v55, 0.0 }
 0x4f6   : > { %v734_v57 = vadd.f32 1e-05, %v733_v56 }
 0x4f8   : > { %1315 = vrsqrt.f32 %v734_v57 }
 0x505   : > { %v1316_v60 = vpop.eup %1315 }
 0x506   : > { %v737_v62 = vmul.f32 %v1316_v60, %v736_v59 }
 0x508   : > { %v742_v63 = vmul.f32 %v741_v58, %v737_v62 }
 0x50a   : > { %v747_v1 = vadd.f32 %v746_v61, %v742_v63 }
 0x50c   : > { %v748_v2 = vmul.f32 0.5, %v747_v1 }
 0x50e   : > { %1317 = vtanh.f32 %v748_v2 }
 0x51b   : > { %v1318_v3 = vpop.eup %1317 }
 0x51c   : > { %v750_v4 = vmul.f32 0.5, %v1318_v3 }
 0x51e   : > { %v751_v5 = vadd.f32 0.5, %v750_v4 }
 0x520   : > { %v769_v6 = vpack.c.bf16 %v751_v5, %v751_v5 }
 0x522   : > { %1181 = vmatmul.mubr.bf16.vlgmr.msra.gmra.mxu1 %v769_v6 }
 0x5e2   : > { %v856_v9 = vpop.f32.mrf.mxu1 }
 0x5e3   : > { %v857_v11 = vadd.f32 %v856_v9, %v773_v8 }
 0x5e4   : > { %v1182_v12 = vpop.f32.mrf.mxu1 }
 0x5e5   : > { %v865_v15 = vmul.f32 %v1063_v10, %v857_v11 }
 0x5e6   : > { %v859_v16 = vpop.f32.mrf.mxu1 }
 0x5e7   : > { %866 = vadd.xlane.f32.xlu0 %v865_v15  ;;  %v869_v17 = vmul.f32 %v865_v15, %v865_v15 }
 0x5e8   : > { %v1183_v19 = vpop.f32.mrf.mxu1 }
 0x5e9   : > { %870 = vadd.xlane.f32.xlu1 %v869_v17 }
 0x670   : > { %v867_v20 = vpop.xlane.xlu0 %866 }
 0x671   : > { %v868_v21 = vmul.f32 0.0625, %v867_v20 }
 0x672   : > { %v871_v22 = vpop.xlane.xlu1 %870 }
 0x673   : > { %v873_v23 = vmul.f32 %v868_v21, %v868_v21  ;;  %v872_v13 = vmul.f32 0.0625, %v871_v22  ;;  %v878_v26 = vsub.f32 %v857_v11, %v868_v21 }
 0x675   : > { %v874_v24 = vsub.f32 %v872_v13, %v873_v23 }
 0x677   : > { %v875_v14 = vmax.f32 %v874_v24, 0.0 }
 0x679   : > { %v876_v25 = vadd.f32 1e-05, %v875_v14 }
 0x67b   : > { %1319 = vrsqrt.f32 %v876_v25 }
 0x688   : > { %v1320_v27 = vpop.eup %1319 }
 0x689   : > { %v879_v29 = vmul.f32 %v1320_v27, %v878_v26 }
 0x68b   : > { %v884_v30 = vmul.f32 %v883_v0, %v879_v29 }
 0x68d   : > { %v889_v31 = vadd.f32 %v888_v28, %v884_v30 }
 0x68f   : > { %1321 = vtanh.f32 %v889_v31 }
 0x69c   : > { %v1322_v41 = vpop.eup %1321 }
 0x69d   : > { %891 = vst [vmem:[%s324_s30] sm:$0xff] %v1322_v41 }
 0x69e   : > { %1468 = shalt.err (!%p1465_p11)
}
 0x69f   : > { %s1469_s13 = scalar_lea.hbm %s1837_s18, 128  ;;  %s1473_s1 = scalar_lea.hbm %s1880_s6, 256 }
 0x6a0   : > { %p1470_p13 = scmp.ne.s32.totalorder %s1837_s18, %s1469_s13  ;;  %p1474_p4 = scmp.lt.s32.totalorder %s1837_s18, %s1880_s6 }
 0x6a1   : > { %p1475_p6 = scmp.lt.s32.totalorder %s1473_s1, %s1469_s13 }
 0x6a2   : > { %p1471_p1 = pnand %p1470_p13, %p1900_p7 }
 0x6a3   : > { %p1476_p5 = por %p1475_p6, %p1474_p4 }
 0x6a4   : > { %p1472_p3 = pneg %p1471_p1 }
 0x6a6   : > { %p1477_p8 = pnand %p1476_p5, %p1472_p3 }
 0x6a8   : > { %1480 = shalt.err (!%p1477_p8)
}
 0x6a9   : > { %1202 = dma.vmem_to_hbm [thread:$0]  (%p1900_p7), %s907_s8, 128, %s1837_s18, %s893_s25  }
 0x6aa PF: > { %s918_s26 = sand.u32 1, %s1515_s21   ;;  %p1901_p10 = scmp.ne.s32.totalorder %s1892_s17, 0 }
 0x6ab   : > { %p1902_p0 = scmp.ge.s32.totalorder %s1527_s24, 2  ;;  %s919_s30 = scalar_lea.sflag [#allocation4], %s918_s26 }
 0x6ad   : > { %p1222_p12 = pnand %p1902_p0, %p1901_p10 }
 0x6af   : > { %p1223_p2 = pneg %p1222_p12 }
 0x6b1   : > { %1510 = dma.done.wait (%p1223_p2), %s919_s30, 128  }
 0x6b2   : > { %1512 = vsyncadd (%p1223_p2), %s919_s30, 4294967168  ;;  %p21_p9 = scmp.ge.s32.totalorder %s1675_s9, 4   ;;  %s1903_s21 = smov %s1519_s22 }
 0x6b3   : > { %s1904_s22 = smov %s1523_s23  ;;  %s1905_s23 = smov %s1686_s14 }
 0x6b4   : > { %s1906_s24 = smov %s1675_s9  ;;  %23 = sbr.rel (!%p21_p9) target bundleno = 9 (0x9), region = 108 }
 0x6b9   :  { %924 = vsyncpa [#allocation3], 1 }
 0x6ba   :  { %926 = vsyncpa [#allocation3 + $0x1], 1 }
 0x6bb   :  { %927 = vsyncpa [#allocation6], 1 }
 0x6bc   :  { %928 = vsyncpa [#allocation9], 1 }
 0x6bd   :  { %929 = vsyncpa [#allocation4], 1 }
 0x6be   :  { %931 = vsyncpa [#allocation4 + $0x1], 1 }

// kernel: tpu_custom_call.1
= control target key start
LH: loop header
LB: loop body
LE: loop exit
PB: predicated region body
PF: predicated region fallthrough
CT: control target
= control target key end

     0   :  { %s1874_s0 = inlined_call_operand.hbm [shape: f32[16,128], index: 0, kind: input, shape index: {}]   ;;  %s1875_s1 = inlined_call_operand.hbm [shape: bf16[128,128], index: 1, kind: input, shape index: {}]   ;;  %s1876_s2 = inlined_call_operand.hbm [shape: bf16[2,128,128], index: 2, kind: input, shape index: {}]   ;;  %s1877_s3 = inlined_call_operand.hbm [shape: bf16[128,128], index: 3, kind: input, shape index: {}]   ;;  %s1878_s4 = inlined_call_operand.hbm [shape: f32[3,3,128], index: 4, kind: input, shape index: {}]   ;;  %s1879_s5 = inlined_call_operand.vmem [shape: f32[3,128], index: 5, kind: input, shape index: {}]   ;;  %s1880_s6 = inlined_call_operand.hbm [shape: f32[16,128], index: 6, kind: output, shape index: {}]  }
   0x1   :  { %1885 = sst [smem:[#allocation16_spill]] %s1875_s1 }
   0x2   :  { %11 = vsyncpa [#allocation3], 0 }
   0x3   :  { %13 = vsyncpa [#allocation3 + $0x1], 0 }
   0x4   :  { %14 = vsyncpa [#allocation6], 0 }
   0x5   :  { %15 = vsyncpa [#allocation9], 0 }
   0x6   :  { %16 = vsyncpa [#allocation4], 0 }
   0x7   :  { %18 = vsyncpa [#allocation4 + $0x1], 0  ;;  %s1574_s21 = smov 0   ;;  %s1576_s22 = smov 0  }
   0x8   :  { %s1578_s23 = smov 0   ;;  %s1580_s24 = smov 0  }
   0x9 LB: > { %s1529_s25 = smov [#allocation5]   ;;  %s1595_s27 = sadd.s32 4294967295, %s1527_s24   ;;  %s1527_s24 = sphi %s1580_s24, %s1906_s24   ;;  %s1523_s23 = sphi %s1578_s23, %s1905_s23   ;;  %s1519_s22 = sphi %s1576_s22, %s1904_s22   ;;  %s1515_s21 = sphi %s1574_s21, %s1903_s21  }
   0xa   : > { %s198_s26 = sshll.u32 %s1529_s25, 4  ;;  %p1015_p0 = scmp.ge.s32.totalorder %s1527_s24, 1  ;;  %s199_s26 = int_to_ptr.vmem [resolvable:$true] %s198_s26 }
   0xb   : > { %p1881_p1 = scmp.eq.s32.totalorder %s1595_s27, 0  ;;  %p186_p2 = scmp.lt.s32.totalorder %s1527_s24, 3 }
   0xc   : > { %s1530_s29 = smov [#allocation8]   ;;  %s1531_s8 = smov [#allocation7]  }
   0xd   : > { %p1600_p3 = pnand %p1015_p0, %p186_p2  ;;  %s224_s30 = sshll.u32 %s1530_s29, 4  ;;  %s1613_s30 = int_to_ptr.vmem [resolvable:$true] %s224_s30 }
   0xe   : > { %s211_s9 = sshll.u32 %s1531_s8, 4  ;;  %s1334_s10 = scalar_lea.vmem %s199_s26, 1024  ;;  %s1615_s9 = int_to_ptr.vmem [resolvable:$true] %s211_s9 }
   0xf   : > { %s1886_s28 = scalar_select %p1600_p3, 1, 0 }
  0x10   : > { %p1204_p5 = pneg %p1600_p3  ;;  %p1335_p8 = scmp.ne.s32.totalorder %s199_s26, %s1334_s10 }
  0x11   : > { %p1342_p11 = scmp.lt.s32.totalorder %s199_s26, %s199_s26  ;;  %p1343_p12 = scmp.lt.s32.totalorder %s1334_s10, %s1334_s10 }
  0x12   : > { %p1609_p6 = pnand %p1204_p5, %p1881_p1 }
  0x13   : > { %p1344_p13 = por %p1343_p12, %p1342_p11 }
  0x14   : > { %p1325_p7 = pneg %p1609_p6 }
  0x16   : > { %p1337_p9 = pnand %p1335_p8, %p1325_p7 }
  0x18   : > { %p1338_p10 = pneg %p1337_p9 }
  0x1a   : > { %p1345_p0 = pnand %p1344_p13, %p1338_p10 }
  0x1c   : > { %1348 = shalt.err (!%p1345_p0)
}
  0x1d   : > { %s1532_s11 = smov 64   ;;  %s1533_s12 = smov 4  }
  0x1e   : > { %s1888_s1 = sld [smem:[#allocation16_spill]]  ;;  %s1360_s15 = scalar_lea.vmem %s1613_s30, 1024 }
  0x1f   : > { %p1361_p2 = scmp.ne.s32.totalorder %s1613_s30, %s1360_s15  ;;  %p1368_p9 = scmp.lt.s32.totalorder %s1613_s30, %s1613_s30 }
  0x20   : > { %p1369_p10 = scmp.lt.s32.totalorder %s1360_s15, %s1360_s15 }
  0x21   : > { %p1363_p5 = pnand %p1361_p2, %p1325_p7 }
  0x22   : > { %p1370_p11 = por %p1369_p10, %p1368_p9 }
  0x23   : > { %p1364_p8 = pneg %p1363_p5 }
  0x24   : > { %1207 = dma.hbm_to_vmem [thread:$0]  (!%p1609_p6), %s1888_s1, 1024, %s199_s26, [#allocation6], %s1532_s11, %s1532_s11, %s1533_s12  }
  0x25   : > { %p1371_p12 = pnand %p1370_p11, %p1364_p8 }
  0x27   : > { %1374 = shalt.err (!%p1371_p12)
}
  0x28   : > { %1213 = dma.hbm_to_vmem [thread:$0]  (!%p1609_p6), %s1877_s3, 1024, %s1613_s30, [#allocation9], %s1532_s11, %s1532_s11, %s1533_s12  }
  0x29   : > { %s1386_s18 = scalar_lea.vmem %s1615_s9, 2048  ;;  %p1394_p5 = scmp.lt.s32.totalorder %s1615_s9, %s1615_s9 }
  0x2a   : > { %p1387_p13 = scmp.ne.s32.totalorder %s1615_s9, %s1386_s18  ;;  %p1395_p8 = scmp.lt.s32.totalorder %s1386_s18, %s1386_s18 }
  0x2c   : > { %p1389_p0 = pnand %p1387_p13, %p1325_p7  ;;  %p1396_p9 = por %p1395_p8, %p1394_p5 }
  0x2e   : > { %p1390_p2 = pneg %p1389_p0 }
  0x30   : > { %p1397_p10 = pnand %p1396_p9, %p1390_p2 }
  0x32   : > { %1400 = shalt.err (!%p1397_p10)
}
  0x33   : > { %1210 = dma.hbm_to_vmem [thread:$0]  (!%p1609_p6), %s1876_s2, 2048, %s1615_s9, [#allocation6], %s1532_s11, %s1532_s11, %s1533_s12  }
  0x34   : > { %s1534_s25 = smov [#allocation10]  }
  0x35   : > { %s237_s26 = sshll.u32 %s1534_s25, 4  ;;  %s238_s26 = int_to_ptr.vmem [resolvable:$true] %s237_s26 }
  0x36   : > { %s1412_s29 = scalar_lea.vmem %s238_s26, 192  ;;  %p1420_p0 = scmp.lt.s32.totalorder %s238_s26, %s238_s26 }
  0x37   : > { %p1413_p11 = scmp.ne.s32.totalorder %s238_s26, %s1412_s29  ;;  %p1421_p2 = scmp.lt.s32.totalorder %s1412_s29, %s1412_s29 }
  0x39   : > { %p1415_p12 = pnand %p1413_p11, %p1325_p7  ;;  %p1422_p5 = por %p1421_p2, %p1420_p0 }
  0x3b   : > { %p1416_p13 = pneg %p1415_p12 }
  0x3d   : > { %p1423_p8 = pnand %p1422_p5, %p1416_p13 }
  0x3f   : > { %1426 = shalt.err (!%p1423_p8)
}
  0x40   : > { %1216 = dma.hbm_to_vmem [thread:$0]  (!%p1609_p6), %s1878_s4, 192, %s238_s26, [#allocation9], %s1532_s11, %s1532_s11, %s1533_s12  }
  0x41   : > { %s1014_s7 = sadd.s32 4294967294, %s1527_s24   ;;  %s1675_s9 = sadd.s32 1, %s1527_s24  }
  0x42   : > { %s28_s10 = ssub.s32 %s1527_s24, %s1675_s9  ;;  %s31_s13 = sadd.s32 1, %s1523_s23 }
  0x43   : > { %p29_p7 = scmp.eq.s32.totalorder %s28_s10, 0  ;;  %p38_p9 = scmp.ne.s32.totalorder %s1523_s23, %s1519_s22 }
  0x44   : > { %p39_p10 = scmp.eq.s32.totalorder %s1527_s24, 0  ;;  %p44_p11 = scmp.ne.s32.totalorder %s1519_s22, %s1515_s21 }
  0x45   : > { %s1686_s14 = scalar_select %p29_p7, %s1523_s23, %s31_s13  }
  0x46   : > { %p1688_p12 = por %p39_p10, %p38_p9  ;;  %p1694_p6 = por %p1881_p1, %p44_p11 }
  0x47   : > { %p173_p13 = scmp.eq.s32.totalorder %s1595_s27, 1  ;;  %p179_p0 = scmp.eq.s32.totalorder %s1014_s7, 1 }
  0x48   : > { %s1890_s11 = scalar_select %p1694_p6, 1, 0 }
  0x49   : > { %p1229_p2 = scmp.lt.s32.totalorder %s1527_s24, 2  ;;  %s254_s12 = sand.u32 1, %s1523_s23  }
  0x4a   : > { %p1701_p5 = por %p173_p13, %p38_p9  ;;  %p1705_p8 = por %p179_p0, %p44_p11 }
  0x4b   : > { %s1021_s18 = sshll.u32 %s254_s12, 3  ;;  %s1022_s19 = sshll.u32 %s1527_s24, 7 }
  0x4c   : > { %s1891_s16 = scalar_select %p1701_p5, 1, 0 }
  0x4d   : > { %s1892_s17 = scalar_select %p1705_p8, 1, 0 }
  0x4e   : > { %s1713_s26 = scalar_lea.hbm %s1874_s0, %s1022_s19  ;;  %s258_s29 = scalar_lea.vmem [#allocation2], %s1021_s18 }
  0x4f   : > { %s265_s30 = sshll.u32 %s258_s29, 4  ;;  %p1717_p7 = pnand %p1229_p2, %p1688_p12  ;;  %s266_s30 = int_to_ptr.vmem [resolvable:$true] %s265_s30 }
  0x50   : > { %s255_s7 = scalar_lea.sflag [#allocation3], %s254_s12  ;;  %s1427_s10 = scalar_lea.hbm %s1713_s26, 128 }
  0x51   : > { %p1428_p9 = scmp.ne.s32.totalorder %s1713_s26, %s1427_s10  ;;  %p1429_p10 = pneg %p1717_p7 }
  0x52   : > { %s1432_s20 = scalar_lea.hbm %s1874_s0, 256  ;;  %p1433_p0 = scmp.lt.s32.totalorder %s1713_s26, %s1874_s0 }
  0x53   : > { %p1430_p11 = pnand %p1429_p10, %p1428_p9  ;;  %p1434_p12 = scmp.lt.s32.totalorder %s1432_s20, %s1427_s10 }
  0x55   : > { %p1431_p13 = pneg %p1430_p11  ;;  %p1435_p2 = por %p1434_p12, %p1433_p0 }
  0x57   : > { %p1436_p4 = pnand %p1435_p2, %p1431_p13 }
  0x59   : > { %1439 = shalt.err (!%p1436_p4)
}
  0x5a   : > { %s1440_s15 = scalar_lea.vmem %s266_s30, 128  ;;  %s1535_s12 = smov [#allocation2]  }
  0x5b   : > { %p1441_p1 = scmp.ne.s32.totalorder %s266_s30, %s1440_s15  ;;  %s1445_s29 = sshll.u32 %s1535_s12, 4  ;;  %s1446_s29 = int_to_ptr.vmem [resolvable:$false] %s1445_s29 }
  0x5c   : > { %s1447_s1 = scalar_lea.vmem %s1446_s29, 256  ;;  %p1448_p9 = scmp.lt.s32.totalorder %s266_s30, %s1446_s29 }
  0x5d   : > { %p1443_p8 = pnand %p1441_p1, %p1429_p10  ;;  %p1449_p11 = scmp.lt.s32.totalorder %s1447_s1, %s1440_s15 }
  0x5f   : > { %p1444_p5 = pneg %p1443_p8  ;;  %p1450_p6 = por %p1449_p11, %p1448_p9 }
  0x61   : > { %p1451_p3 = pnand %p1450_p6, %p1444_p5 }
  0x63   : > { %1454 = shalt.err (!%p1451_p3)
}
  0x64   : > { %1220 = dma.hbm_to_vmem [thread:$0]  (!%p1717_p7), %s1713_s26, 128, %s266_s30, %s255_s7  }
  0x65   : > { %p1894_p13 = scmp.ne.s32.totalorder %s1886_s28, 0 }
  0x66   : > { %s1738_s10 = sand.u32 (!%p1894_p13), 1, %s1519_s22   ;;  %p1895_p1 = scmp.ne.s32.totalorder (!%p1894_p13), %s1890_s11, 0 }
  0x67   : > { %274 = sbr.rel (%p1894_p13) target bundleno = 1706 (0x6aa), region = 44  ;;  %s1024_s13 = sshll.u32 (!%p1894_p13), %s1738_s10, 3 }
  0x68   : > { %s277_s19 = scalar_lea.sflag (!%p1894_p13), [#allocation3], %s1738_s10  ;;  %s1744_s1 = scalar_lea.vmem (!%p1894_p13), [#allocation2], %s1024_s13 }
  0x6c   : > { %1498 = dma.done.wait (%p1895_p1), %s277_s19, 128  }
  0x6d   : > { %1500 = vsyncadd (%p1895_p1), %s277_s19, 4294967168  ;;  %p1896_p3 = scmp.eq.s32.totalorder %s1595_s27, 0 }
  0x6f   : > { %1502 = dma.done.wait (%p1896_p3), [#allocation6], 3072   ;;  %p1897_p4 = pmov %p1896_p3 }
  0x70   : > { %p1898_p6 = pmov %p1896_p3 }
  0x71   : > { %1504 = vsyncadd (%p1897_p4), [#allocation6], 4294964224 }
  0x72   : > { %1506 = dma.done.wait (%p1898_p6), [#allocation9], 1216   ;;  %p1899_p5 = pmov %p1896_p3 }
  0x73   : > { %v1536_v0 = vmov 0.0   ;;  %vm1537_vm0 = vmmov 0   ;;  %v1275_v1 = vld [vmem:[#allocation5 + $0x38] sm:$0xff]   ;;  %v1276_v2 = vld [vmem:[#allocation5 + $0x30] sm:$0xff]   ;;  %v1277_v3 = vld [vmem:[#allocation5 + $0x28] sm:$0xff]   ;;  %v345_v11 = vlaneseq  ;;  %s1065_s26 = sshll.u32 %s1595_s27, 7 }
  0x74   : > { %1508 = vsyncadd (%p1899_p5), [#allocation9], 4294966080  ;;  %1104 = vmatprep.subr.bf16.mxu0 %v1536_v0  ;;  %1120 = vmatprep.mubr.msk.bf16.mxu0 %vm1537_vm0, %v1536_v0  ;;  %v1278_v4 = vld [vmem:[#allocation5 + $0x20] sm:$0xff]   ;;  %v1279_v5 = vld [vmem:[#allocation5 + $0x18] sm:$0xff]   ;;  %s324_s30 = scalar_lea.vmem [#allocation11], %s1024_s13  ;;  %s1837_s18 = scalar_lea.hbm %s1880_s6, %s1065_s26 }
  0x75   : > { %1124 = vmatprep.subr.bf16.mxu1 %v1536_v0  ;;  %1140 = vmatprep.mubr.msk.bf16.mxu1 %vm1537_vm0, %v1536_v0  ;;  %v1280_v6 = vld [vmem:[#allocation5 + $0x10] sm:$0xff]   ;;  %v1281_v7 = vld [vmem:[#allocation5 + $0x8] sm:$0xff]   ;;  %v1282_v8 = vld [vmem:[#allocation5] sm:$0xff]   ;;  %v346_v12 = vshrl.u32 %v345_v11, 7  ;;  %v1777_v14 = vand.u32 127, %v345_v11  ;;  %s906_s8 = sshll.u32 %s324_s30, 4  ;;  %s907_s8 = int_to_ptr.vmem [resolvable:$true] %s906_s8 }
  0x76   : > { %1105 = vmatpush3.bf16.msra.mxu0 %v1275_v1  ;;  %v326_v9 = vld [vmem:[%s1744_s1] sm:$0xff]  ;;  %v343_v15 = vld [vmem:[#allocation10] sm:$0x7]  ;;  %v1285_v27 = vld [vmem:[#allocation7 + $0x28] sm:$0xff]   ;;  %s893_s25 = scalar_lea.sflag [#allocation4], %s1738_s10  ;;  %s1455_s15 = scalar_lea.vmem %s907_s8, 128 }
  0x77   : > { %1106 = vmatprep.subr.bf16.mxu0 %v1536_v0  ;;  %v344_v10 = vpack.c.bf16 %v326_v9, %v326_v9  ;;  %v1775_v13 = vsub.s32 0, %v346_v12  ;;  %vm439_vm1 = vcmp.lt.s32.totalorder %v1777_v14, 32  ;;  %v1283_v25 = vld [vmem:[#allocation7 + $0x38] sm:$0xff]   ;;  %v1284_v26 = vld [vmem:[#allocation7 + $0x30] sm:$0xff]   ;;  %v1286_v28 = vld [vmem:[#allocation7 + $0x20] sm:$0xff]   ;;  %v1793_v41 = vsub.s32 1, %v346_v12  ;;  %p1456_p8 = scmp.ne.s32.totalorder %s907_s8, %s1455_s15 }
  0x78   : > { %v1782_v18 = vsel %vm439_vm1, 1.0, %v1536_v0  ;;  %1125 = vmatpush3.bf16.msra.mxu1 %v1283_v25  ;;  %v1287_v29 = vld [vmem:[#allocation7 + $0x18] sm:$0xff]   ;;  %v1288_v30 = vld [vmem:[#allocation7 + $0x10] sm:$0xff]   ;;  %v1289_v31 = vld [vmem:[#allocation7 + $0x8] sm:$0xff]   ;;  %v1795_v42 = vsub.s32 2, %v346_v12  ;;  %vm862_vm2 = vcmp.lt.s32.totalorder %v1777_v14, 16 }
  0x79   : > { %v348_v16 = vrot.slane %v343_v15, %v1775_v13  ;;  %1126 = vmatprep.subr.bf16.mxu1 %v1536_v0  ;;  %v1290_v32 = vld [vmem:[#allocation7] sm:$0xff]   ;;  %v460_v43 = vrot.slane %v343_v15, %v1793_v41  ;;  %v1291_v1 = vld [vmem:[#allocation7 + $0x78] sm:$0xff]   ;;  %p1900_p7 = scmp.ne.s32.totalorder %s1891_s16, 0  ;;  %s1538_s12 = smov [#allocation11]  }
  0x7a   : > { %1107 = vmatpush3.bf16.msra.mxu0 %v1276_v2  ;;  %v465_v46 = vrot.slane %v343_v15, %v1795_v42  ;;  %v488_v55 = vld [vmem:[#allocation10 + $0x4] sm:$0x7]  ;;  %v1292_v2 = vld [vmem:[#allocation7 + $0x70] sm:$0xff]   ;;  %s1459_s29 = sshll.u32 %s1538_s12, 4  ;;  %s1460_s29 = int_to_ptr.vmem [resolvable:$false] %s1459_s29 }
  0x7b   : > { %1108 = vmatprep.subr.bf16.mxu0 %v1536_v0  ;;  %v493_v56 = vrot.slane %v488_v55, %v1775_v13  ;;  %p1457_p10 = pnand %p1456_p8, %p1900_p7  ;;  %s1461_s27 = scalar_lea.vmem %s1460_s29, 256 }
  0x7c   : > { %1127 = vmatpush3.bf16.msra.mxu1 %v1284_v26  ;;  %p1462_p12 = scmp.lt.s32.totalorder %s907_s8, %s1460_s29  ;;  %p1463_p2 = scmp.lt.s32.totalorder %s1461_s27, %s1455_s15 }
  0x7d   : > { %1128 = vmatprep.subr.bf16.mxu1 %v1536_v0  ;;  %p1458_p0 = pneg %p1457_p10 }
  0x7e   : > { %1109 = vmatpush3.bf16.msra.mxu0 %v1277_v3  ;;  %v1293_v3 = vld [vmem:[#allocation7 + $0x68] sm:$0xff]   ;;  %p1464_p9 = por %p1463_p2, %p1462_p12 }
  0x7f   : > { %1110 = vmatprep.subr.bf16.mxu0 %v1536_v0 }
  0x80   : > { %1129 = vmatpush3.bf16.msra.mxu1 %v1285_v27  ;;  %p1465_p11 = pnand %p1464_p9, %p1458_p0 }
  0x81   : > { %1130 = vmatprep.subr.bf16.mxu1 %v1536_v0 }
  0x82   : > { %1111 = vmatpush3.bf16.msra.mxu0 %v1278_v4  ;;  %v1294_v4 = vld [vmem:[#allocation7 + $0x60] sm:$0xff]  }
  0x83   : > { %1112 = vmatprep.subr.bf16.mxu0 %v1536_v0 }
  0x84   : > { %1131 = vmatpush3.bf16.msra.mxu1 %v1286_v28 }
  0x85   : > { %1132 = vmatprep.subr.bf16.mxu1 %v1536_v0 }
  0x86   : > { %1113 = vmatpush3.bf16.msra.mxu0 %v1279_v5  ;;  %v1295_v5 = vld [vmem:[#allocation7 + $0x58] sm:$0xff]  }
  0x87   : > { %1114 = vmatprep.subr.bf16.mxu0 %v1536_v0 }
  0x88   : > { %1133 = vmatpush3.bf16.msra.mxu1 %v1287_v29 }
  0x89   : > { %1134 = vmatprep.subr.bf16.mxu1 %v1536_v0 }
  0x8a   : > { %1115 = vmatpush3.bf16.msra.mxu0 %v1280_v6  ;;  %v1296_v6 = vld [vmem:[#allocation7 + $0x50] sm:$0xff]  }
  0x8b   : > { %1116 = vmatprep.subr.bf16.mxu0 %v1536_v0 }
  0x8c   : > { %1135 = vmatpush3.bf16.msra.mxu1 %v1288_v30 }
  0x8d   : > { %1136 = vmatprep.subr.bf16.mxu1 %v1536_v0 }
  0x8e   : > { %1117 = vmatpush3.bf16.msra.mxu0 %v1281_v7  ;;  %v1297_v7 = vld [vmem:[#allocation7 + $0x48] sm:$0xff]  }
  0x8f   : > { %1118 = vmatprep.subr.bf16.mxu0 %v1536_v0 }
  0x90   : > { %1137 = vmatpush3.bf16.msra.mxu1 %v1289_v31 }
  0x91   : > { %1138 = vmatprep.subr.bf16.mxu1 %v1536_v0 }
  0x92   : > { %1119 = vmatpush3.bf16.msra.mxu0 %v1282_v8  ;;  %v1298_v8 = vld [vmem:[#allocation7 + $0x40] sm:$0xff]  }
  0x93   : > { %1144 = vmatprep.subr.bf16.mxu0 %v1536_v0 }
  0x94   : > { %1139 = vmatpush3.bf16.msra.mxu1 %v1290_v32  ;;  %v629_v32 = vld [vmem:[#allocation10 + $0x8] sm:$0x7] }
  0x95   : > { %1121 = vmatmul.mubr.bf16.vlgmr.msra.gmra.mxu0 %v344_v10  ;;  %1164 = vmatprep.subr.bf16.mxu1 %v1536_v0 }
  0x96   : > { %1160 = vmatprep.mubr.msk.bf16.mxu0 %vm1537_vm0, %v1536_v0  ;;  %1145 = vmatpush3.bf16.msra.mxu0 %v1291_v1 }
  0x97   : > { %1146 = vmatprep.subr.bf16.mxu0 %v1536_v0 }
  0x9a   : > { %1147 = vmatpush3.bf16.msra.mxu0 %v1292_v2 }
  0x9b   : > { %1148 = vmatprep.subr.bf16.mxu0 %v1536_v0 }
  0x9e   : > { %1149 = vmatpush3.bf16.msra.mxu0 %v1293_v3 }
  0x9f   : > { %1150 = vmatprep.subr.bf16.mxu0 %v1536_v0 }
  0xa2   : > { %1151 = vmatpush3.bf16.msra.mxu0 %v1294_v4 }
  0xa3   : > { %1152 = vmatprep.subr.bf16.mxu0 %v1536_v0 }
  0xa6   : > { %1153 = vmatpush3.bf16.msra.mxu0 %v1295_v5 }
  0xa7   : > { %1154 = vmatprep.subr.bf16.mxu0 %v1536_v0 }
  0xaa   : > { %1155 = vmatpush3.bf16.msra.mxu0 %v1296_v6 }
  0xab   : > { %1156 = vmatprep.subr.bf16.mxu0 %v1536_v0 }
  0xae   : > { %1157 = vmatpush3.bf16.msra.mxu0 %v1297_v7  ;;  %v768_v7 = vld [vmem:[%s1879_s5] sm:$0x7] }
  0xaf   : > { %1158 = vmatprep.subr.bf16.mxu0 %v1536_v0 }
  0xb2   : > { %1159 = vmatpush3.bf16.msra.mxu0 %v1298_v8  ;;  %v773_v8 = vrot.slane %v768_v7, %v1775_v13 }
 0x155   : > { %v431_v17 = vpop.f32.mrf.mxu0 }
 0x156   : > { %v432_v19 = vadd.f32 %v431_v17, %v348_v16 }
 0x157   : > { %v1122_v20 = vpop.f32.mrf.mxu0 }
 0x158   : > { %v442_v21 = vmul.f32 %v1782_v18, %v432_v19  ;;  %v600_v20 = vrot.slane %v488_v55, %v1793_v41 }
 0x159   : > { %v434_v22 = vpop.f32.mrf.mxu0 }
 0x15a   : > { %443 = vadd.xlane.f32.xlu0 %v442_v21  ;;  %v446_v24 = vmul.f32 %v442_v21, %v442_v21 }
 0x15b   : > { %v1123_v23 = vpop.f32.mrf.mxu0 }
 0x15c   : > { %v605_v23 = vrot.slane %v488_v55, %v1795_v42 }
 0x15e   : > { %447 = vadd.xlane.f32.xlu0 %v446_v24 }
 0x1e3   : > { %v444_v33 = vpop.xlane.xlu0 %443 }
 0x1e4   : > { %v445_v34 = vmul.f32 0.03125, %v444_v33  ;;  %v634_v33 = vrot.slane %v629_v32, %v1775_v13 }
 0x1e6   : > { %v450_v36 = vmul.f32 %v445_v34, %v445_v34  ;;  %v455_v44 = vsub.f32 %v432_v19, %v445_v34 }
 0x1e7   : > { %v448_v35 = vpop.xlane.xlu0 %447 }
 0x1e8   : > { %v449_v37 = vmul.f32 0.03125, %v448_v35 }
 0x1ea   : > { %v451_v38 = vsub.f32 %v449_v37, %v450_v36 }
 0x1ec   : > { %v452_v39 = vmax.f32 %v451_v38, 0.0 }
 0x1ee   : > { %v453_v40 = vadd.f32 1e-05, %v452_v39 }
 0x1f0   : > { %1307 = vrsqrt.f32 %v453_v40 }
 0x1fd   : > { %v1308_v45 = vpop.eup %1307 }
 0x1fe   : > { %v456_v47 = vmul.f32 %v1308_v45, %v455_v44  ;;  %v1300_v44 = vld [vmem:[#allocation8 + $0x30] sm:$0xff]   ;;  %v1301_v45 = vld [vmem:[#allocation8 + $0x28] sm:$0xff]  }
 0x200   : > { %v461_v48 = vmul.f32 %v460_v43, %v456_v47  ;;  %v1299_v43 = vld [vmem:[#allocation8 + $0x38] sm:$0xff]   ;;  %v1304_v47 = vld [vmem:[#allocation8 + $0x10] sm:$0xff]  }
 0x202   : > { %v466_v49 = vadd.f32 %v465_v46, %v461_v48  ;;  %v1302_v46 = vld [vmem:[#allocation8 + $0x20] sm:$0xff]   ;;  %v1305_v48 = vld [vmem:[#allocation8 + $0x8] sm:$0xff]  }
 0x204   : > { %v467_v50 = vmul.f32 0.5, %v466_v49  ;;  %v1306_v49 = vld [vmem:[#allocation8] sm:$0xff]  }
 0x206   : > { %1309 = vtanh.f32 %v467_v50 }
 0x213   : > { %v1310_v51 = vpop.eup %1309 }
 0x214   : > { %v469_v52 = vmul.f32 0.5, %v1310_v51 }
 0x216   : > { %v470_v53 = vadd.f32 0.5, %v469_v52 }
 0x218   : > { %v489_v54 = vpack.c.bf16 %v470_v53, %v470_v53 }
 0x21a   : > { %1141 = vmatmul.mubr.bf16.vlgmr.msra.gmra.mxu1 %v489_v54 }
 0x21b   : > { %1180 = vmatprep.mubr.msk.bf16.mxu1 %vm1537_vm0, %v1536_v0  ;;  %1165 = vmatpush3.bf16.msra.mxu1 %v1299_v43 }
 0x21c   : > { %1166 = vmatprep.subr.bf16.mxu1 %v1536_v0 }
 0x21f   : > { %1167 = vmatpush3.bf16.msra.mxu1 %v1300_v44 }
 0x220   : > { %1168 = vmatprep.subr.bf16.mxu1 %v1536_v0 }
 0x223   : > { %1169 = vmatpush3.bf16.msra.mxu1 %v1301_v45 }
 0x224   : > { %1170 = vmatprep.subr.bf16.mxu1 %v1536_v0 }
 0x227   : > { %1171 = vmatpush3.bf16.msra.mxu1 %v1302_v46 }
 0x228   : > { %1172 = vmatprep.subr.bf16.mxu1 %v1536_v0 }
 0x2da   : > { %v576_v57 = vpop.f32.mrf.mxu1 }
 0x2db   : > { %v577_v58 = vadd.f32 %v576_v57, %v493_v56 }
 0x2dc   : > { %v1142_v59 = vpop.f32.mrf.mxu1 }
 0x2dd   : > { %v582_v60 = vmul.f32 %v1782_v18, %v577_v58 }
 0x2de   : > { %v579_v61 = vpop.f32.mrf.mxu1 }
 0x2df   : > { %583 = vadd.xlane.f32.xlu1 %v582_v60  ;;  %v586_v63 = vmul.f32 %v582_v60, %v582_v60  ;;  %v746_v61 = vrot.slane %v629_v32, %v1795_v42 }
 0x2e0   : > { %v1143_v62 = vpop.f32.mrf.mxu1 }
 0x2e3   : > { %587 = vadd.xlane.f32.xlu1 %v586_v63 }
 0x368   : > { %v584_v9 = vpop.xlane.xlu1 %583 }
 0x369   : > { %v585_v10 = vmul.f32 0.03125, %v584_v9 }
 0x36b   : > { %v590_v12 = vmul.f32 %v585_v10, %v585_v10  ;;  %v595_v21 = vsub.f32 %v577_v58, %v585_v10  ;;  %v741_v58 = vrot.slane %v629_v32, %v1793_v41  ;;  %v1063_v10 = vsel %vm862_vm2, 1.0, %v1536_v0 }
 0x36c   : > { %v588_v11 = vpop.xlane.xlu1 %587 }
 0x36d   : > { %v589_v15 = vmul.f32 0.03125, %v588_v11 }
 0x36f   : > { %v591_v16 = vsub.f32 %v589_v15, %v590_v12 }
 0x371   : > { %v592_v17 = vmax.f32 %v591_v16, 0.0 }
 0x373   : > { %v593_v19 = vadd.f32 1e-05, %v592_v17 }
 0x375   : > { %1311 = vrsqrt.f32 %v593_v19 }
 0x382   : > { %v1312_v22 = vpop.eup %1311 }
 0x383   : > { %v596_v24 = vmul.f32 %v1312_v22, %v595_v21 }
 0x385   : > { %v601_v25 = vmul.f32 %v600_v20, %v596_v24 }
 0x387   : > { %v606_v26 = vadd.f32 %v605_v23, %v601_v25 }
 0x389   : > { %v607_v27 = vmul.f32 0.5, %v606_v26 }
 0x38b   : > { %1313 = vtanh.f32 %v607_v27 }
 0x398   : > { %v1314_v28 = vpop.eup %1313 }
 0x399   : > { %v609_v29 = vmul.f32 0.5, %v1314_v28  ;;  %v888_v28 = vrot.slane %v768_v7, %v1795_v42 }
 0x39b   : > { %v610_v30 = vadd.f32 0.5, %v609_v29 }
 0x39d   : > { %v630_v31 = vpack.c.bf16 %v610_v30, %v610_v30 }
 0x39f   : > { %1161 = vmatmul.mubr.bf16.vlgmr.msra.gmra.mxu0 %v630_v31 }
 0x45f   : > { %v717_v34 = vpop.f32.mrf.mxu0 }
 0x460   : > { %v718_v35 = vadd.f32 %v717_v34, %v634_v33 }
 0x461   : > { %v1162_v36 = vpop.f32.mrf.mxu0 }
 0x462   : > { %v723_v37 = vmul.f32 %v1782_v18, %v718_v35  ;;  %v1303_v18 = vld [vmem:[#allocation8 + $0x18] sm:$0xff]  }
 0x463   : > { %v720_v38 = vpop.f32.mrf.mxu0  ;;  %1173 = vmatpush3.bf16.msra.mxu1 %v1303_v18 }
 0x464   : > { %724 = vadd.xlane.f32.xlu0 %v723_v37  ;;  %v727_v39 = vmul.f32 %v723_v37, %v723_v37  ;;  %1174 = vmatprep.subr.bf16.mxu1 %v1536_v0 }
 0x465   : > { %v1163_v40 = vpop.f32.mrf.mxu0 }
 0x466   : > { %728 = vadd.xlane.f32.xlu1 %v727_v39 }
 0x467   : > { %1175 = vmatpush3.bf16.msra.mxu1 %v1304_v47 }
 0x468   : > { %1176 = vmatprep.subr.bf16.mxu1 %v1536_v0 }
 0x46b   : > { %1177 = vmatpush3.bf16.msra.mxu1 %v1305_v48 }
 0x46c   : > { %1178 = vmatprep.subr.bf16.mxu1 %v1536_v0  ;;  %v883_v0 = vrot.slane %v768_v7, %v1793_v41 }
 0x46f   : > { %1179 = vmatpush3.bf16.msra.mxu1 %v1306_v49 }
 0x4ed   : > { %v725_v50 = vpop.xlane.xlu0 %724 }
 0x4ee   : > { %v726_v51 = vmul.f32 0.03125, %v725_v50 }
 0x4ef   : > { %v729_v52 = vpop.xlane.xlu1 %728 }
 0x4f0   : > { %v731_v53 = vmul.f32 %v726_v51, %v726_v51  ;;  %v730_v54 = vmul.f32 0.03125, %v729_v52  ;;  %v736_v59 = vsub.f32 %v718_v35, %v726_v51 }
 0x4f2   : > { %v732_v55 = vsub.f32 %v730_v54, %v731_v53 }
 0x4f4   : > { %v733_v56 = vmax.f32 %v732_v55, 0.0 }
 0x4f6   : > { %v734_v57 = vadd.f32 1e-05, %v733_v56 }
 0x4f8   : > { %1315 = vrsqrt.f32 %v734_v57 }
 0x505   : > { %v1316_v60 = vpop.eup %1315 }
 0x506   : > { %v737_v62 = vmul.f32 %v1316_v60, %v736_v59 }
 0x508   : > { %v742_v63 = vmul.f32 %v741_v58, %v737_v62 }
 0x50a   : > { %v747_v1 = vadd.f32 %v746_v61, %v742_v63 }
 0x50c   : > { %v748_v2 = vmul.f32 0.5, %v747_v1 }
 0x50e   : > { %1317 = vtanh.f32 %v748_v2 }
 0x51b   : > { %v1318_v3 = vpop.eup %1317 }
 0x51c   : > { %v750_v4 = vmul.f32 0.5, %v1318_v3 }
 0x51e   : > { %v751_v5 = vadd.f32 0.5, %v750_v4 }
 0x520   : > { %v769_v6 = vpack.c.bf16 %v751_v5, %v751_v5 }
 0x522   : > { %1181 = vmatmul.mubr.bf16.vlgmr.msra.gmra.mxu1 %v769_v6 }
 0x5e2   : > { %v856_v9 = vpop.f32.mrf.mxu1 }
 0x5e3   : > { %v857_v11 = vadd.f32 %v856_v9, %v773_v8 }
 0x5e4   : > { %v1182_v12 = vpop.f32.mrf.mxu1 }
 0x5e5   : > { %v865_v15 = vmul.f32 %v1063_v10, %v857_v11 }
 0x5e6   : > { %v859_v16 = vpop.f32.mrf.mxu1 }
 0x5e7   : > { %866 = vadd.xlane.f32.xlu0 %v865_v15  ;;  %v869_v17 = vmul.f32 %v865_v15, %v865_v15 }
 0x5e8   : > { %v1183_v19 = vpop.f32.mrf.mxu1 }
 0x5e9   : > { %870 = vadd.xlane.f32.xlu1 %v869_v17 }
 0x670   : > { %v867_v20 = vpop.xlane.xlu0 %866 }
 0x671   : > { %v868_v21 = vmul.f32 0.0625, %v867_v20 }
 0x672   : > { %v871_v22 = vpop.xlane.xlu1 %870 }
 0x673   : > { %v873_v23 = vmul.f32 %v868_v21, %v868_v21  ;;  %v872_v13 = vmul.f32 0.0625, %v871_v22  ;;  %v878_v26 = vsub.f32 %v857_v11, %v868_v21 }
 0x675   : > { %v874_v24 = vsub.f32 %v872_v13, %v873_v23 }
 0x677   : > { %v875_v14 = vmax.f32 %v874_v24, 0.0 }
 0x679   : > { %v876_v25 = vadd.f32 1e-05, %v875_v14 }
 0x67b   : > { %1319 = vrsqrt.f32 %v876_v25 }
 0x688   : > { %v1320_v27 = vpop.eup %1319 }
 0x689   : > { %v879_v29 = vmul.f32 %v1320_v27, %v878_v26 }
 0x68b   : > { %v884_v30 = vmul.f32 %v883_v0, %v879_v29 }
 0x68d   : > { %v889_v31 = vadd.f32 %v888_v28, %v884_v30 }
 0x68f   : > { %1321 = vtanh.f32 %v889_v31 }
 0x69c   : > { %v1322_v41 = vpop.eup %1321 }
 0x69d   : > { %891 = vst [vmem:[%s324_s30] sm:$0xff] %v1322_v41 }
 0x69e   : > { %1468 = shalt.err (!%p1465_p11)
}
 0x69f   : > { %s1469_s13 = scalar_lea.hbm %s1837_s18, 128  ;;  %s1473_s1 = scalar_lea.hbm %s1880_s6, 256 }
 0x6a0   : > { %p1470_p13 = scmp.ne.s32.totalorder %s1837_s18, %s1469_s13  ;;  %p1474_p4 = scmp.lt.s32.totalorder %s1837_s18, %s1880_s6 }
 0x6a1   : > { %p1475_p6 = scmp.lt.s32.totalorder %s1473_s1, %s1469_s13 }
 0x6a2   : > { %p1471_p1 = pnand %p1470_p13, %p1900_p7 }
 0x6a3   : > { %p1476_p5 = por %p1475_p6, %p1474_p4 }
 0x6a4   : > { %p1472_p3 = pneg %p1471_p1 }
 0x6a6   : > { %p1477_p8 = pnand %p1476_p5, %p1472_p3 }
 0x6a8   : > { %1480 = shalt.err (!%p1477_p8)
}
 0x6a9   : > { %1202 = dma.vmem_to_hbm [thread:$0]  (%p1900_p7), %s907_s8, 128, %s1837_s18, %s893_s25  }
 0x6aa PF: > { %s918_s26 = sand.u32 1, %s1515_s21   ;;  %p1901_p10 = scmp.ne.s32.totalorder %s1892_s17, 0 }
 0x6ab   : > { %p1902_p0 = scmp.ge.s32.totalorder %s1527_s24, 2  ;;  %s919_s30 = scalar_lea.sflag [#allocation4], %s918_s26 }
 0x6ad   : > { %p1222_p12 = pnand %p1902_p0, %p1901_p10 }
 0x6af   : > { %p1223_p2 = pneg %p1222_p12 }
 0x6b1   : > { %1510 = dma.done.wait (%p1223_p2), %s919_s30, 128  }
 0x6b2   : > { %1512 = vsyncadd (%p1223_p2), %s919_s30, 4294967168  ;;  %p21_p9 = scmp.ge.s32.totalorder %s1675_s9, 4   ;;  %s1903_s21 = smov %s1519_s22 }
 0x6b3   : > { %s1904_s22 = smov %s1523_s23  ;;  %s1905_s23 = smov %s1686_s14 }
 0x6b4   : > { %s1906_s24 = smov %s1675_s9  ;;  %23 = sbr.rel (!%p21_p9) target bundleno = 9 (0x9), region = 108 }
 0x6b9   :  { %924 = vsyncpa [#allocation3], 1 }
 0x6ba   :  { %926 = vsyncpa [#allocation3 + $0x1], 1 }
 0x6bb   :  { %927 = vsyncpa [#allocation6], 1 }
 0x6bc   :  { %928 = vsyncpa [#allocation9], 1 }
 0x6bd   :  { %929 = vsyncpa [#allocation4], 1 }
 0x6be   :  { %931 = vsyncpa [#allocation4 + $0x1], 1 }

</bundles_post_ra>
